<compile_context>
chip_gen: v7x
topology: tpu7x:2x2x1
jax: 0.10.0
libtpu: 0.0.40
codegen_flags: <defaults>
</compile_context>

<pallas_src>
import functools

import jax
import jax.numpy as jnp
from jax.experimental import pallas as pl
from jax.experimental.pallas import tpu as pltpu

_LANE = 128
_SUBLANE = 8


def _ceil_to(x, m):
    return (int(x) + m - 1) // m * m


# ----------------------------------------------------------------------------- kernel


def _nnw_kernel(d_ref, si_ref, sj_ref, mi_ref, mj_ref,
                w1_ref, b1_ref, wa_ref, wb_ref, b2_ref,
                out_ref, *, scaling_factor):
    TB, N, D = d_ref.shape
    R = TB * N

    w1 = w1_ref[...]                      # (D, D)  pre-transposed: rows @ w1
    b1 = b1_ref[...]                      # (1, D)  f32
    wa = wa_ref[...].reshape(1, 1, D)     # layer-2 weight half acting on transform(d)
    wb = wb_ref[...].reshape(1, 1, D)     # layer-2 weight half acting on transform(s)
    b2 = b2_ref[...]                      # (1, 1)  f32

    def layer1_then_reduce(x_ref, w_out):
        # relu(x @ w1 + b1), reduced immediately against one layer-2 weight half:
        # one MXU matmul per stream, then lane-dense multiply + lane reduction.
        x = x_ref[...].reshape(R, D)
        h = jnp.dot(x, w1, preferred_element_type=jnp.float32) + b1    # (R, D) f32
        h = jnp.maximum(h, 0.0)
        return jnp.sum(h.reshape(TB, N, D) * w_out, axis=2)            # (TB, N) f32

    a_d = layer1_then_reduce(d_ref, wa)
    a_si = layer1_then_reduce(si_ref, wb)
    a_sj = layer1_then_reduce(sj_ref, wb)

    mi = mi_ref[...]                      # (TB, N) float {0,1}
    mj = mj_ref[...]

    z1 = a_d + a_si + b2                  # per-item layer-2 output for (d, si)
    z2 = a_d + a_sj + b2                  # per-item layer-2 output for (d, sj)
    per_item = mi * z1 - mj * z2          # masked_select + sum == mask-multiply + sum

    # Reduce over N with the batch tile in the lane dim -> packed (1, TB) result.
    sdiff = jnp.sum(per_item.T, axis=0, keepdims=True)                  # (1, TB)
    res = jax.nn.sigmoid(scaling_factor * sdiff)
    out_ref[...] = res[None].astype(out_ref.dtype)                      # (1, 1, TB)


# ----------------------------------------------------------------------------- wrapper


def _per_step_vmem_bytes(TB, N, D, act_itemsize):
    # Conservative per-grid-step VMEM estimate, accounting for lane/sublane padding
    # of D<128 / N<8 tiles (D=32 tiles occupy full 128-lane vregs).
    padD = _ceil_to(D, _LANE)
    padN = _ceil_to(N, _SUBLANE)
    act = 3 * 2 * TB * padN * padD * act_itemsize                 # d/si/sj, double-buffered
    msk = 2 * 2 * _ceil_to(TB, _SUBLANE) * _ceil_to(N, _LANE) * 4  # mi/mj, double-buffered
    tmp = 3 * TB * padN * padD * 4                                 # f32 layer-1 temporaries
    wts = 2 * (padD * padD + 3 * padD + _LANE) * 4                 # w1, b1, wa, wb, b2
    out = 2 * _SUBLANE * _ceil_to(TB, _LANE) * 4                   # packed output tile
    return act + msk + tmp + wts + out


def _vmem_budget_bytes():
    phys = None
    try:
        info = pltpu.get_tpu_info()
        phys = getattr(info, "vmem_capacity_bytes", None)
    except Exception:  # noqa: BLE001 - fall back to the smallest-generation assumption
        phys = None
    if not phys:
        phys = 64 << 20  # assume the tightest generation (v7x: 64 MiB per TensorCore)
    return min(int(phys) // 2, 48 << 20)


def _default_block_b(B, N, D, act_itemsize):
    budget = _vmem_budget_bytes()
    fixed = _per_step_vmem_bytes(0, N, D, act_itemsize)            # resident weights
    padD = _ceil_to(D, _LANE)
    padN = _ceil_to(N, _SUBLANE)
    per_elem = (3 * 2 * padN * padD * act_itemsize                 # activation double-buffers
                + 3 * padN * padD * 4                              # f32 temporaries
                + 2 * 2 * _ceil_to(N, _LANE) * 4                   # the two masks
                + 2 * _SUBLANE * 4)                                # output tile
    tb = max(_SUBLANE, (budget - fixed) // per_elem)
    if tb >= _LANE:
        tb = (tb // _LANE) * _LANE        # multiple of 128 -> unmasked lane-dense output stores
    else:
        tb = max(_SUBLANE, (tb // _SUBLANE) * _SUBLANE)
    # Don't do much more padded work than B requires.
    cap = _ceil_to(B, _LANE) if B >= _LANE else _ceil_to(B, _SUBLANE)
    return max(_SUBLANE, min(tb, cap))


def nnw_avg_pr_forward(d, si, sj, mi, mj, params, scaling_factor, *, block_b=None):
    """Forward pass of NNWAvgPRModel.

    d, si, sj : (B, N, D) activations, streamed in the dtype they arrive in.  Pass bf16
                to halve HBM traffic (MXU accumulation is f32 either way); do that cast
                upstream of this op -- this wrapper does not touch the big tensors.
    mi, mj    : (B, N) bool/float masks.
    params    : {"w1": (D, D), "b1": (D,), "w2": (1, 2D), "b2": (1,)}  (nn.Linear layout).
    """
    B, N, D = d.shape
    assert si.shape == (B, N, D) and sj.shape == (B, N, D)
    assert mi.shape == (B, N) and mj.shape == (B, N)
    w1, b1, w2, b2 = params["w1"], params["b1"], params["w2"], params["b2"]
    assert w2.shape[-1] == 2 * D, "config['H'] must equal 2 * config['D']"

    act_dtype = d.dtype
    if si.dtype != act_dtype:
        si = si.astype(act_dtype)
    if sj.dtype != act_dtype:
        sj = sj.astype(act_dtype)
    itemsize = jnp.dtype(act_dtype).itemsize

    if block_b is None:
        TB = _default_block_b(B, N, D, itemsize)
    else:
        TB = max(_SUBLANE, _ceil_to(block_b, _SUBLANE))
    NB = -(-B // TB)   # cdiv: no wrapper-side jnp.pad of the big tensors; the ragged tail
                       # block is handled by Pallas block masking and sliced off below.

    # Tiny parameter / mask preprocessing (negligible vs. the 3*B*N*D activation stream).
    mi_f = mi.astype(jnp.float32)
    mj_f = mj.astype(jnp.float32)
    w1_t = jnp.asarray(w1).T.astype(act_dtype)            # (D, D): kernel does rows @ w1_t
    b1_2d = jnp.asarray(b1).reshape(1, D).astype(jnp.float32)
    wa = jnp.asarray(w2)[:, :D].astype(jnp.float32)       # acts on transform(d)
    wb = jnp.asarray(w2)[:, D:].astype(jnp.float32)       # acts on transform(s)
    b2_2d = jnp.asarray(b2).reshape(1, 1).astype(jnp.float32)

    vmem_limit = int(min(96 << 20,
                         max(32 << 20,
                             1.5 * _per_step_vmem_bytes(TB, N, D, itemsize) + (8 << 20))))

    kernel = functools.partial(_nnw_kernel, scaling_factor=float(scaling_factor))

    def call(dim_sem):
        return pl.pallas_call(
            kernel,
            out_shape=jax.ShapeDtypeStruct((NB, 1, TB), jnp.float32),
            grid=(NB,),
            in_specs=[
                pl.BlockSpec((TB, N, D), lambda b: (b, 0, 0)),   # d
                pl.BlockSpec((TB, N, D), lambda b: (b, 0, 0)),   # si
                pl.BlockSpec((TB, N, D), lambda b: (b, 0, 0)),   # sj
                pl.BlockSpec((TB, N), lambda b: (b, 0)),         # mi (float, lane-dense)
                pl.BlockSpec((TB, N), lambda b: (b, 0)),         # mj
                # Weight operands: constant index_map -> fetched once, resident in VMEM.
                # (At D<=128 their total footprint is <200 KiB, so single-buffering them
                #  via pipeline_mode would reclaim a negligible amount of VMEM here.)
                pl.BlockSpec((D, D), lambda b: (0, 0)),          # w1^T
                pl.BlockSpec((1, D), lambda b: (0, 0)),          # b1
                pl.BlockSpec((1, D), lambda b: (0, 0)),          # wa
                pl.BlockSpec((1, D), lambda b: (0, 0)),          # wb
                pl.BlockSpec((1, 1), lambda b: (0, 0)),          # b2
            ],
            out_specs=pl.BlockSpec((1, 1, TB), lambda b: (b, 0, 0)),
            compiler_params=pltpu.CompilerParams(
                dimension_semantics=(dim_sem,),
                vmem_limit_bytes=vmem_limit),
        )(d, si, sj, mi_f, mj_f, w1_t, b1_2d, wa, wb, b2_2d)

    # v7x: shard batch blocks across the two TensorCores; fall back to the portable
    # "parallel" semantics on single-core generations / toolchains that reject it.
    candidates = []
    core_parallel = getattr(pltpu, "CORE_PARALLEL", None)
    if core_parallel is not None and NB >= 2 and NB % 2 == 0:
        candidates.append(core_parallel)
    candidates.append("parallel")

    out, err = None, None
    for sem in candidates:
        try:
            out = call(sem)
            break
        except Exception as e:  # noqa: BLE001 - retry with the portable semantics
            err = e
    if out is None:
        raise err

    return out.reshape(NB * TB)[:B]


# ----------------------------------------------------------------------------- reference & test


def _reference(d, si, sj, mi, mj, params, scaling_factor):
    # Pure-JAX reimplementation of the PyTorch forward (correctness check).
    w1, b1, w2, b2 = params["w1"], params["b1"], params["w2"], params["b2"]

    def transform(x):
        return jax.nn.relu(x @ w1.T + b1)

    def predict(dd, s, m):
        x = jnp.concatenate([transform(dd), transform(s)], axis=2)
        z = (x @ w2.T + b2)[..., 0]                      # (B, N)
        return jnp.sum(z * m.astype(z.dtype), axis=1)    # masked_select + sum

    s1 = predict(d, si, mi)
    s2 = predict(d, sj, mj)
    return jax.nn.sigmoid(scaling_factor * (s1 - s2))


if __name__ == "__main__":
    B, N, D = 32, 8, 32
    scaling_factor = 2.0

    key = jax.random.PRNGKey(0)
    kd, ksi, ksj, kmi, kmj, kw1, kb1, kw2, kb2, kbig = jax.random.split(key, 10)

    d = jax.random.normal(kd, (B, N, D), dtype=jnp.float32)
    si = jax.random.normal(ksi, (B, N, D), dtype=jnp.float32)
    sj = jax.random.normal(ksj, (B, N, D), dtype=jnp.float32)
    mi = jax.random.uniform(kmi, (B, N)) > 0.5
    mj = jax.random.uniform(kmj, (B, N)) > 0.5

    # Deterministic synthetic parameters (nn.Linear(D,D) and nn.Linear(2D,1) shapes).
    params = {
        "w1": jax.random.normal(kw1, (D, D), dtype=jnp.float32) * 0.1,       # layer1.weight
        "b1": jax.random.normal(kb1, (D,), dtype=jnp.float32) * 0.1,         # layer1.bias
        "w2": jax.random.normal(kw2, (1, 2 * D), dtype=jnp.float32) * 0.1,   # layer2.weight
        "b2": jax.random.normal(kb2, (1,), dtype=jnp.float32) * 0.1,         # layer2.bias
    }

    ref = _reference(d, si, sj, mi, mj, params, scaling_factor)

    # 1) f32 streaming, auto batch tile (single grid step): strict tolerance.
    out = jax.block_until_ready(nnw_avg_pr_forward(d, si, sj, mi, mj, params, scaling_factor))
    assert out.shape == (B,)
    assert jnp.allclose(out, ref, atol=1e-5, rtol=1e-5)

    # 2) f32, forced small tile -> multi-block grid (exercises CORE_PARALLEL + fallback path).
    out2 = jax.block_until_ready(
        nnw_avg_pr_forward(d, si, sj, mi, mj, params, scaling_factor, block_b=16))
    assert jnp.allclose(out2, ref, atol=1e-5, rtol=1e-5)

    # 3) bf16 streaming (cast done upstream of the op, not inside the wrapper): loose tolerance.
    d_h, si_h, sj_h = d.astype(jnp.bfloat16), si.astype(jnp.bfloat16), sj.astype(jnp.bfloat16)
    out3 = jax.block_until_ready(
        nnw_avg_pr_forward(d_h, si_h, sj_h, mi, mj, params, scaling_factor))
    assert jnp.allclose(out3, ref, atol=5e-2, rtol=5e-2)

    # 4) Larger ragged batch, multi-block bf16 path (B=1000 is not a multiple of TB=256):
    #    exercises the pad-free ragged-tail handling.
    BB = 1000
    kd2, ksi2, ksj2, kmi2, kmj2 = jax.random.split(kbig, 5)
    d2 = jax.random.normal(kd2, (BB, N, D), dtype=jnp.float32)
    si2 = jax.random.normal(ksi2, (BB, N, D), dtype=jnp.float32)
    sj2 = jax.random.normal(ksj2, (BB, N, D), dtype=jnp.float32)
    mi2 = jax.random.uniform(kmi2, (BB, N)) > 0.5
    mj2 = jax.random.uniform(kmj2, (BB, N)) > 0.5
    ref2 = _reference(d2, si2, sj2, mi2, mj2, params, scaling_factor)
    out4 = jax.block_until_ready(
        nnw_avg_pr_forward(d2.astype(jnp.bfloat16), si2.astype(jnp.bfloat16),
                           sj2.astype(jnp.bfloat16), mi2, mj2, params,
                           scaling_factor, block_b=256))
    assert out4.shape == (BB,)
    assert jnp.allclose(out4, ref2, atol=5e-2, rtol=5e-2)

    print("KERNEL_OK")
</pallas_src>

<mosaic_0001>
module attributes {stable_mosaic.version = 11 : i64} {
  func.func @_nnw_kernel(%arg0: i32, %arg1: memref<32x8x32xf32, #tpu.memory_space<vmem>>, %arg2: memref<32x8x32xf32, #tpu.memory_space<vmem>>, %arg3: memref<32x8x32xf32, #tpu.memory_space<vmem>>, %arg4: memref<32x8xf32, #tpu.memory_space<vmem>>, %arg5: memref<32x8xf32, #tpu.memory_space<vmem>>, %arg6: memref<32x32xf32, #tpu.memory_space<vmem>>, %arg7: memref<1x32xf32, #tpu.memory_space<vmem>>, %arg8: memref<1x32xf32, #tpu.memory_space<vmem>>, %arg9: memref<1x32xf32, #tpu.memory_space<vmem>>, %arg10: memref<1x1xf32, #tpu.memory_space<vmem>>, %arg11: memref<1x1x32xf32, #tpu.memory_space<vmem>>) attributes {dimension_semantics = [#tpu.dimension_semantics<parallel>], iteration_bounds = array<i64: 1>, scalar_prefetch = 0 : i64, scratch_operands = 0 : i64, tpu.core_type = #tpu.core_type<tc>, window_params = [{transform_indices = @transform_0, window_bounds = array<i64: 32, 8, 32>}, {transform_indices = @transform_1, window_bounds = array<i64: 32, 8, 32>}, {transform_indices = @transform_2, window_bounds = array<i64: 32, 8, 32>}, {transform_indices = @transform_3, window_bounds = array<i64: 32, 8>}, {transform_indices = @transform_4, window_bounds = array<i64: 32, 8>}, {pipeline_mode = #tpu.pipeline_mode<synchronous>, transform_indices = @transform_5, window_bounds = array<i64: 32, 32>}, {pipeline_mode = #tpu.pipeline_mode<synchronous>, transform_indices = @transform_6, window_bounds = array<i64: 1, 32>}, {pipeline_mode = #tpu.pipeline_mode<synchronous>, transform_indices = @transform_7, window_bounds = array<i64: 1, 32>}, {pipeline_mode = #tpu.pipeline_mode<synchronous>, transform_indices = @transform_8, window_bounds = array<i64: 1, 32>}, {pipeline_mode = #tpu.pipeline_mode<synchronous>, transform_indices = @transform_9, window_bounds = array<i64: 1, 1>}, {transform_indices = @transform_10, window_bounds = array<i64: 1, 1, 32>}]} {
    %c0 = arith.constant 0 : index
    %c0_0 = arith.constant 0 : index
    %0 = vector.load %arg6[%c0, %c0_0] : memref<32x32xf32, #tpu.memory_space<vmem>>, vector<32x32xf32>
    %c0_1 = arith.constant 0 : index
    %c0_2 = arith.constant 0 : index
    %1 = vector.load %arg7[%c0_1, %c0_2] : memref<1x32xf32, #tpu.memory_space<vmem>>, vector<1x32xf32>
    %c0_3 = arith.constant 0 : index
    %c0_4 = arith.constant 0 : index
    %2 = vector.load %arg8[%c0_3, %c0_4] : memref<1x32xf32, #tpu.memory_space<vmem>>, vector<1x32xf32>
    %3 = vector.shape_cast %2 : vector<1x32xf32> to vector<1x1x32xf32>
    %c0_5 = arith.constant 0 : index
    %c0_6 = arith.constant 0 : index
    %4 = vector.load %arg9[%c0_5, %c0_6] : memref<1x32xf32, #tpu.memory_space<vmem>>, vector<1x32xf32>
    %5 = vector.shape_cast %4 : vector<1x32xf32> to vector<1x1x32xf32>
    %c0_7 = arith.constant 0 : index
    %c0_8 = arith.constant 0 : index
    %6 = vector.load %arg10[%c0_7, %c0_8] : memref<1x1xf32, #tpu.memory_space<vmem>>, vector<1x1xf32>
    %c0_9 = arith.constant 0 : index
    %c0_10 = arith.constant 0 : index
    %c0_11 = arith.constant 0 : index
    %7 = vector.load %arg1[%c0_9, %c0_10, %c0_11] : memref<32x8x32xf32, #tpu.memory_space<vmem>>, vector<32x8x32xf32>
    %8 = vector.shape_cast %7 : vector<32x8x32xf32> to vector<256x32xf32>
    %cst = arith.constant dense<0.000000e+00> : vector<256x32xf32>
    %9 = tpu.matmul %8, %0, %cst {dimension_numbers = #tpu.dot_dimension_numbers<[1], [0], [0], [1], [0, 0, 1, 1], [], []>} : vector<256x32xf32>, vector<32x32xf32>, vector<256x32xf32> -> vector<256x32xf32>
    %10 = vector.broadcast %1 : vector<1x32xf32> to vector<256x32xf32>
    %11 = arith.addf %9, %10 : vector<256x32xf32>
    %cst_12 = arith.constant 0.000000e+00 : f32
    %12 = vector.broadcast %cst_12 : f32 to vector<256x32xf32>
    %13 = arith.maximumf %11, %12 : vector<256x32xf32>
    %14 = vector.shape_cast %13 : vector<256x32xf32> to vector<32x8x32xf32>
    %15 = vector.broadcast %3 : vector<1x1x32xf32> to vector<32x8x32xf32>
    %16 = arith.mulf %14, %15 : vector<32x8x32xf32>
    %cst_13 = arith.constant dense<0.000000e+00> : vector<32x8xf32>
    %17 = vector.multi_reduction <add>, %16, %cst_13 [2] : vector<32x8x32xf32> to vector<32x8xf32>
    %c0_14 = arith.constant 0 : index
    %c0_15 = arith.constant 0 : index
    %c0_16 = arith.constant 0 : index
    %18 = vector.load %arg2[%c0_14, %c0_15, %c0_16] : memref<32x8x32xf32, #tpu.memory_space<vmem>>, vector<32x8x32xf32>
    %19 = vector.shape_cast %18 : vector<32x8x32xf32> to vector<256x32xf32>
    %cst_17 = arith.constant dense<0.000000e+00> : vector<256x32xf32>
    %20 = tpu.matmul %19, %0, %cst_17 {dimension_numbers = #tpu.dot_dimension_numbers<[1], [0], [0], [1], [0, 0, 1, 1], [], []>} : vector<256x32xf32>, vector<32x32xf32>, vector<256x32xf32> -> vector<256x32xf32>
    %21 = vector.broadcast %1 : vector<1x32xf32> to vector<256x32xf32>
    %22 = arith.addf %20, %21 : vector<256x32xf32>
    %cst_18 = arith.constant 0.000000e+00 : f32
    %23 = vector.broadcast %cst_18 : f32 to vector<256x32xf32>
    %24 = arith.maximumf %22, %23 : vector<256x32xf32>
    %25 = vector.shape_cast %24 : vector<256x32xf32> to vector<32x8x32xf32>
    %26 = vector.broadcast %5 : vector<1x1x32xf32> to vector<32x8x32xf32>
    %27 = arith.mulf %25, %26 : vector<32x8x32xf32>
    %cst_19 = arith.constant dense<0.000000e+00> : vector<32x8xf32>
    %28 = vector.multi_reduction <add>, %27, %cst_19 [2] : vector<32x8x32xf32> to vector<32x8xf32>
    %c0_20 = arith.constant 0 : index
    %c0_21 = arith.constant 0 : index
    %c0_22 = arith.constant 0 : index
    %29 = vector.load %arg3[%c0_20, %c0_21, %c0_22] : memref<32x8x32xf32, #tpu.memory_space<vmem>>, vector<32x8x32xf32>
    %30 = vector.shape_cast %29 : vector<32x8x32xf32> to vector<256x32xf32>
    %cst_23 = arith.constant dense<0.000000e+00> : vector<256x32xf32>
    %31 = tpu.matmul %30, %0, %cst_23 {dimension_numbers = #tpu.dot_dimension_numbers<[1], [0], [0], [1], [0, 0, 1, 1], [], []>} : vector<256x32xf32>, vector<32x32xf32>, vector<256x32xf32> -> vector<256x32xf32>
    %32 = vector.broadcast %1 : vector<1x32xf32> to vector<256x32xf32>
    %33 = arith.addf %31, %32 : vector<256x32xf32>
    %cst_24 = arith.constant 0.000000e+00 : f32
    %34 = vector.broadcast %cst_24 : f32 to vector<256x32xf32>
    %35 = arith.maximumf %33, %34 : vector<256x32xf32>
    %36 = vector.shape_cast %35 : vector<256x32xf32> to vector<32x8x32xf32>
    %37 = vector.broadcast %5 : vector<1x1x32xf32> to vector<32x8x32xf32>
    %38 = arith.mulf %36, %37 : vector<32x8x32xf32>
    %cst_25 = arith.constant dense<0.000000e+00> : vector<32x8xf32>
    %39 = vector.multi_reduction <add>, %38, %cst_25 [2] : vector<32x8x32xf32> to vector<32x8xf32>
    %c0_26 = arith.constant 0 : index
    %c0_27 = arith.constant 0 : index
    %40 = vector.load %arg4[%c0_26, %c0_27] : memref<32x8xf32, #tpu.memory_space<vmem>>, vector<32x8xf32>
    %c0_28 = arith.constant 0 : index
    %c0_29 = arith.constant 0 : index
    %41 = vector.load %arg5[%c0_28, %c0_29] : memref<32x8xf32, #tpu.memory_space<vmem>>, vector<32x8xf32>
    %42 = arith.addf %17, %28 : vector<32x8xf32>
    %43 = vector.broadcast %6 : vector<1x1xf32> to vector<32x8xf32>
    %44 = arith.addf %42, %43 : vector<32x8xf32>
    %45 = arith.addf %17, %39 : vector<32x8xf32>
    %46 = vector.broadcast %6 : vector<1x1xf32> to vector<32x8xf32>
    %47 = arith.addf %45, %46 : vector<32x8xf32>
    %48 = arith.mulf %40, %44 : vector<32x8xf32>
    %49 = arith.mulf %41, %47 : vector<32x8xf32>
    %50 = arith.subf %48, %49 : vector<32x8xf32>
    %51 = tpu.transpose %50, [1, 0] : vector<32x8xf32> -> vector<8x32xf32>
    %cst_30 = arith.constant dense<0.000000e+00> : vector<32xf32>
    %52 = vector.multi_reduction <add>, %51, %cst_30 [0] : vector<8x32xf32> to vector<32xf32>
    %53 = vector.shape_cast %52 : vector<32xf32> to vector<1x32xf32>
    %cst_31 = arith.constant 2.000000e+00 : f32
    %54 = vector.broadcast %cst_31 : f32 to vector<1x32xf32>
    %55 = arith.mulf %54, %53 : vector<1x32xf32>
    %56 = arith.negf %55 : vector<1x32xf32>
    %57 = math.exp %56 : vector<1x32xf32>
    %cst_32 = arith.constant 1.000000e+00 : f32
    %58 = vector.broadcast %cst_32 : f32 to vector<1x32xf32>
    %59 = arith.addf %58, %57 : vector<1x32xf32>
    %60 = arith.divf %58, %59 : vector<1x32xf32>
    %61 = vector.shape_cast %60 : vector<1x32xf32> to vector<1x1x32xf32>
    %c0_33 = arith.constant 0 : index
    %c0_34 = arith.constant 0 : index
    %c0_35 = arith.constant 0 : index
    %62 = vector.load %arg11[%c0_33, %c0_34, %c0_35] : memref<1x1x32xf32, #tpu.memory_space<vmem>>, vector<1x1x32xf32>
    tpu.vector_store %arg11[%c0_33, %c0_34, %c0_35], %61 {strides = array<i32>} : memref<1x1x32xf32, #tpu.memory_space<vmem>>, vector<1x1x32xf32>,
    return
  }
  func.func @transform_0(%arg0: i32) -> (i32, i32, i32) {
    %c0_i32 = arith.constant 0 : i32
    %c0_i32_0 = arith.constant 0 : i32
    %c0_i32_1 = arith.constant 0 : i32
    return %arg0, %c0_i32, %c0_i32_0 : i32, i32, i32
  }
  func.func @transform_1(%arg0: i32) -> (i32, i32, i32) {
    %c0_i32 = arith.constant 0 : i32
    %c0_i32_0 = arith.constant 0 : i32
    %c0_i32_1 = arith.constant 0 : i32
    return %arg0, %c0_i32, %c0_i32_0 : i32, i32, i32
  }
  func.func @transform_2(%arg0: i32) -> (i32, i32, i32) {
    %c0_i32 = arith.constant 0 : i32
    %c0_i32_0 = arith.constant 0 : i32
    %c0_i32_1 = arith.constant 0 : i32
    return %arg0, %c0_i32, %c0_i32_0 : i32, i32, i32
  }
  func.func @transform_3(%arg0: i32) -> (i32, i32) {
    %c0_i32 = arith.constant 0 : i32
    %c0_i32_0 = arith.constant 0 : i32
    return %arg0, %c0_i32 : i32, i32
  }
  func.func @transform_4(%arg0: i32) -> (i32, i32) {
    %c0_i32 = arith.constant 0 : i32
    %c0_i32_0 = arith.constant 0 : i32
    return %arg0, %c0_i32 : i32, i32
  }
  func.func @transform_5(%arg0: i32) -> (i32, i32) {
    %c0_i32 = arith.constant 0 : i32
    %c0_i32_0 = arith.constant 0 : i32
    %c0_i32_1 = arith.constant 0 : i32
    return %c0_i32, %c0_i32_0 : i32, i32
  }
  func.func @transform_6(%arg0: i32) -> (i32, i32) {
    %c0_i32 = arith.constant 0 : i32
    %c0_i32_0 = arith.constant 0 : i32
    %c0_i32_1 = arith.constant 0 : i32
    return %c0_i32, %c0_i32_0 : i32, i32
  }
  func.func @transform_7(%arg0: i32) -> (i32, i32) {
    %c0_i32 = arith.constant 0 : i32
    %c0_i32_0 = arith.constant 0 : i32
    %c0_i32_1 = arith.constant 0 : i32
    return %c0_i32, %c0_i32_0 : i32, i32
  }
  func.func @transform_8(%arg0: i32) -> (i32, i32) {
    %c0_i32 = arith.constant 0 : i32
    %c0_i32_0 = arith.constant 0 : i32
    %c0_i32_1 = arith.constant 0 : i32
    return %c0_i32, %c0_i32_0 : i32, i32
  }
  func.func @transform_9(%arg0: i32) -> (i32, i32) {
    %c0_i32 = arith.constant 0 : i32
    %c0_i32_0 = arith.constant 0 : i32
    %c0_i32_1 = arith.constant 0 : i32
    return %c0_i32, %c0_i32_0 : i32, i32
  }
  func.func @transform_10(%arg0: i32) -> (i32, i32, i32) {
    %c0_i32 = arith.constant 0 : i32
    %c0_i32_0 = arith.constant 0 : i32
    %c0_i32_1 = arith.constant 0 : i32
    return %arg0, %c0_i32, %c0_i32_0 : i32, i32, i32
  }
}

</mosaic_0001>

<bundles_post_ra>
// kernel: tpu_custom_call.1
= control target key start
LH: loop header
LB: loop body
LE: loop exit
PB: predicated region body
PF: predicated region fallthrough
CT: control target
= control target key end

     0   :  { %s4114_s0 = inlined_call_operand.hbm [shape: f32[32,8,32], index: 0, kind: input, shape index: {}]   ;;  %s4115_s1 = inlined_call_operand.hbm [shape: f32[32,8,32], index: 1, kind: input, shape index: {}]   ;;  %s4116_s2 = inlined_call_operand.hbm [shape: f32[32,8,32], index: 2, kind: input, shape index: {}]   ;;  %s4117_s3 = inlined_call_operand.vmem [shape: f32[32,8], index: 3, kind: input, shape index: {}]   ;;  %s4118_s4 = inlined_call_operand.vmem [shape: f32[32,8], index: 4, kind: input, shape index: {}]   ;;  %s4119_s5 = inlined_call_operand.vmem [shape: f32[32,32], index: 5, kind: input, shape index: {}]   ;;  %s4120_s6 = inlined_call_operand.vmem [shape: f32[1,32], index: 6, kind: input, shape index: {}]   ;;  %s4121_s7 = inlined_call_operand.vmem [shape: f32[1,32], index: 7, kind: input, shape index: {}]   ;;  %s4122_s8 = inlined_call_operand.vmem [shape: f32[1,32], index: 8, kind: input, shape index: {}]   ;;  %s4123_s9 = inlined_call_operand.<no memory space> [shape: f32[1,1], index: 9, kind: input, shape index: {}]   ;;  %s4124_s10 = inlined_call_operand.hbm [shape: f32[1,1,32], index: 10, kind: output, shape index: {}]  }
   0x1   :  { %v15_v0 = vstv %s4123_s9 }
   0x2   :  { %16 = vst [vmem:[#allocation2] sm:$0x1] %v15_v0 }
   0x3   :  { %17 = vsyncpa [#allocation4], 0 }
   0x4   :  { %18 = vsyncpa [#allocation7], 0 }
   0x5   :  { %19 = vsyncpa [#allocation5], 0  ;;  %s2771_s15 = smov [#allocation6]   ;;  %s2772_s17 = smov [#allocation3]  }
   0x6   :  { %s37_s16 = sshll.u32 %s2771_s15, 4  ;;  %s25_s18 = sshll.u32 %s2772_s17, 4  ;;  %s38_s16 = int_to_ptr.vmem [resolvable:$true] %s37_s16  ;;  %s2836_s18 = int_to_ptr.vmem [resolvable:$true] %s25_s18 }
   0x7   :  { %s2677_s21 = scalar_lea.hbm %s4115_s1, 4096 }
   0x8   :  { %p2678_p0 = scmp.ne.s32.totalorder %s4115_s1, %s2677_s21  ;;  %p2681_p1 = scmp.lt.u32.totalorder %s2677_s21, %s4115_s1 }
   0xa   :  { %p2683_p2 = pnand %p2681_p1, %p2678_p0 }
   0xc   :  { %2686 = shalt.err (!%p2683_p2)
}
   0xd   :  { %s2687_s25 = scalar_lea.vmem %s38_s16, 4096  ;;  %p2692_p4 = scmp.lt.s32.totalorder %s38_s16, %s38_s16 }
   0xe   :  { %p2688_p3 = scmp.ne.s32.totalorder %s38_s16, %s2687_s25  ;;  %p2693_p5 = scmp.lt.s32.totalorder %s2687_s25, %s2687_s25 }
  0x10   :  { %p2694_p6 = por %p2693_p5, %p2692_p4 }
  0x12   :  { %p2695_p7 = pnand %p2694_p6, %p2688_p3 }
  0x14   :  { %2698 = shalt.err (!%p2695_p7)
}
  0x15   :  { %s2773_s26 = smov 128   ;;  %s2774_s27 = smov 8  }
  0x16   :  { %43 = dma.hbm_to_vmem [thread:$0]  %s4115_s1, 4096, %s38_s16, [#allocation7], %s2773_s26, %s2773_s26, %s2774_s27  }
  0x17   :  { %s2699_s12 = scalar_lea.hbm %s4114_s0, 4096 }
  0x18   :  { %p2700_p8 = scmp.ne.s32.totalorder %s4114_s0, %s2699_s12  ;;  %p2703_p9 = scmp.lt.u32.totalorder %s2699_s12, %s4114_s0 }
  0x1a   :  { %p2705_p10 = pnand %p2703_p9, %p2700_p8 }
  0x1c   :  { %2708 = shalt.err (!%p2705_p10)
}
  0x1d   :  { %s2709_s19 = scalar_lea.vmem %s2836_s18, 4096  ;;  %p2714_p12 = scmp.lt.s32.totalorder %s2836_s18, %s2836_s18 }
  0x1e   :  { %p2710_p11 = scmp.ne.s32.totalorder %s2836_s18, %s2709_s19  ;;  %p2715_p13 = scmp.lt.s32.totalorder %s2709_s19, %s2709_s19 }
  0x20   :  { %p2716_p0 = por %p2715_p13, %p2714_p12 }
  0x22   :  { %p2717_p1 = pnand %p2716_p0, %p2710_p11 }
  0x24   :  { %2720 = shalt.err (!%p2717_p1)
}
  0x25   :  { %31 = dma.hbm_to_vmem [thread:$0]  %s4114_s0, 4096, %s2836_s18, [#allocation4], %s2773_s26, %s2773_s26, %s2774_s27  }
  0x26   :  { %s2775_s20 = smov [#allocation8]   ;;  %s2721_s9 = scalar_lea.hbm %s4116_s2, 4096 }
  0x27   :  { %s49_s21 = sshll.u32 %s2775_s20, 4  ;;  %p2722_p2 = scmp.ne.s32.totalorder %s4116_s2, %s2721_s9  ;;  %s50_s21 = int_to_ptr.vmem [resolvable:$true] %s49_s21 }
  0x28   :  { %p2725_p3 = scmp.lt.u32.totalorder %s2721_s9, %s4116_s2 }
  0x2a   :  { %p2727_p4 = pnand %p2725_p3, %p2722_p2 }
  0x2c   :  { %2730 = shalt.err (!%p2727_p4)
}
  0x2d   :  { %s2731_s30 = scalar_lea.vmem %s50_s21, 4096  ;;  %p2736_p6 = scmp.lt.s32.totalorder %s50_s21, %s50_s21 }
  0x2e   :  { %p2732_p5 = scmp.ne.s32.totalorder %s50_s21, %s2731_s30  ;;  %p2737_p7 = scmp.lt.s32.totalorder %s2731_s30, %s2731_s30 }
  0x30   :  { %p2738_p8 = por %p2737_p7, %p2736_p6 }
  0x32   :  { %p2739_p9 = pnand %p2738_p8, %p2732_p5 }
  0x34   :  { %2742 = shalt.err (!%p2739_p9)
}
  0x35   :  { %55 = dma.hbm_to_vmem [thread:$0]  %s4116_s2, 4096, %s50_s21, [#allocation7], %s2773_s26, %s2773_s26, %s2774_s27  }
  0x36   :  { %2765 = dma.done.wait [#allocation4], 4096  }
  0x37   :  { %2766 = vsyncadd [#allocation4], 4294963200 }
  0x38   :  { %2767 = dma.done.wait [#allocation7], 8192  }
  0x39   :  { %2768 = vsyncadd [#allocation7], 4294959104  ;;  %vm125_vm0 = vcmask 261120   ;;  %v79_v1 = vld [vmem:[%s4119_s5] sm:$0xff]  ;;  %v80_v2 = vld [vmem:[%s4119_s5 + $0x8] sm:$0xff]  ;;  %vm1952_vm1 = vcmask 1041409  }
  0x3a   :  { %v81_v3 = vld [vmem:[%s4119_s5 + $0x10] sm:$0xff]  ;;  %v2636_v4 = vpack.c.bf16 %v80_v2, %v79_v1  ;;  %v82_v5 = vld [vmem:[%s4119_s5 + $0x18] sm:$0xff]  ;;  %v87_v6 = vld [vmem:[#allocation3] sm:$0xff]  ;;  %vm1954_vm2 = vcmask 1042434   ;;  %vm1956_vm3 = vcmask 1043459   ;;  %vm1958_vm4 = vcmask 1044484  }
  0x3b   :  { %v103_v7 = vld [vmem:[#allocation3 + $0x80] sm:$0xff]  ;;  %v2640_v8 = vpack.c.bf16 %v82_v5, %v81_v3  ;;  %2476 = vmatprep.mubr.msk.f32.mxu0 %vm125_vm0, %v87_v6  ;;  %v88_v9 = vld [vmem:[#allocation3 + $0x8] sm:$0xff]  ;;  %v89_v11 = vld [vmem:[#allocation3 + $0x10] sm:$0xff]  ;;  %vm1960_vm5 = vcmask 1045509   ;;  %vm1962_vm6 = vcmask 1046534   ;;  %vm1964_vm7 = vcmask 1047559  }
  0x3c   :  { %2500 = vmatprep.mubr.msk.f32.mxu1 %vm125_vm0, %v103_v7  ;;  %2637 = vmatprep.subr.bf16.mxu0 %v2636_v4  ;;  %v104_v10 = vld [vmem:[#allocation3 + $0x88] sm:$0xff]  ;;  %v105_v12 = vld [vmem:[#allocation3 + $0x90] sm:$0xff]  ;;  %v90_v13 = vld [vmem:[#allocation3 + $0x18] sm:$0xff]  ;;  %vm2241_vm8 = vcmask 253952  }
  0x3d   :  { %2660 = vmatprep.subr.bf16.mxu1 %v2636_v4  ;;  %2639 = vmatpush3.bf16.msra.mxu0 %v2636_v4  ;;  %v106_v14 = vld [vmem:[#allocation3 + $0x98] sm:$0xff]  ;;  %v91_v15 = vld [vmem:[#allocation3 + $0x20] sm:$0xff]  ;;  %v92_v17 = vld [vmem:[#allocation3 + $0x28] sm:$0xff] }
  0x3e   :  { %2662 = vmatpush3.bf16.msra.mxu1 %v2636_v4  ;;  %2641 = vmatprep.subr.bf16.mxu0 %v2640_v8  ;;  %v107_v16 = vld [vmem:[#allocation3 + $0xa0] sm:$0xff]  ;;  %v108_v18 = vld [vmem:[#allocation3 + $0xa8] sm:$0xff]  ;;  %v93_v19 = vld [vmem:[#allocation3 + $0x30] sm:$0xff] }
  0x3f   :  { %2661 = vmatprep.subr.bf16.mxu1 %v2640_v8  ;;  %v109_v20 = vld [vmem:[#allocation3 + $0xb0] sm:$0xff]  ;;  %v94_v21 = vld [vmem:[#allocation3 + $0x38] sm:$0xff]  ;;  %v95_v23 = vld [vmem:[#allocation3 + $0x40] sm:$0xff] }
  0x40   :  { %v110_v22 = vld [vmem:[#allocation3 + $0xb8] sm:$0xff]  ;;  %v111_v24 = vld [vmem:[#allocation3 + $0xc0] sm:$0xff]  ;;  %v96_v25 = vld [vmem:[#allocation3 + $0x48] sm:$0xff] }
  0x41   :  { %2643 = vmatpush3.bf16.msra.mxu0 %v2640_v8  ;;  %v112_v26 = vld [vmem:[#allocation3 + $0xc8] sm:$0xff]  ;;  %v97_v27 = vld [vmem:[#allocation3 + $0x50] sm:$0xff]  ;;  %v98_v29 = vld [vmem:[#allocation3 + $0x58] sm:$0xff] }
  0x42   :  { %2663 = vmatpush3.bf16.msra.mxu1 %v2640_v8  ;;  %2653 = vmatprep.subr.bf16.mxu0 %v2636_v4  ;;  %v113_v28 = vld [vmem:[#allocation3 + $0xd0] sm:$0xff]  ;;  %v114_v30 = vld [vmem:[#allocation3 + $0xd8] sm:$0xff]  ;;  %v99_v31 = vld [vmem:[#allocation3 + $0x60] sm:$0xff] }
  0x43   :  { %2645 = vmatprep.subr.bf16.mxu1 %v2636_v4  ;;  %v115_v32 = vld [vmem:[#allocation3 + $0xe0] sm:$0xff]  ;;  %v100_v33 = vld [vmem:[#allocation3 + $0x68] sm:$0xff]  ;;  %v101_v35 = vld [vmem:[#allocation3 + $0x70] sm:$0xff] }
  0x44   :  { %2477 = vmatmul.mubr.msk.f32.vlgmr.msra.gmra.mrb[0].mxu0 %vm125_vm0, %v88_v9  ;;  %v116_v34 = vld [vmem:[#allocation3 + $0xe8] sm:$0xff]  ;;  %v117_v36 = vld [vmem:[#allocation3 + $0xf0] sm:$0xff]  ;;  %v102_v37 = vld [vmem:[#allocation3 + $0x78] sm:$0xff] }
  0x45   :  { %2501 = vmatmul.mubr.msk.f32.vlgmr.msra.gmra.mrb[0].mxu1 %vm125_vm0, %v104_v10  ;;  %2479 = vmatprep.mubr.msk.f32.mxu0 %vm125_vm0, %v89_v11  ;;  %v118_v38 = vld [vmem:[#allocation3 + $0xf8] sm:$0xff]  ;;  %v613_v39 = vld [vmem:[#allocation6] sm:$0xff]  ;;  %v614_v41 = vld [vmem:[#allocation6 + $0x8] sm:$0xff] }
  0x46   :  { %2503 = vmatprep.mubr.msk.f32.mxu1 %vm125_vm0, %v105_v12  ;;  %2647 = vmatpush3.bf16.msra.mxu1 %v2636_v4  ;;  %v1132_v40 = vld [vmem:[#allocation8] sm:$0xff]  ;;  %v1133_v42 = vld [vmem:[#allocation8 + $0x8] sm:$0xff]  ;;  %v1134_v43 = vld [vmem:[#allocation8 + $0x10] sm:$0xff] }
  0x47   :  { %2655 = vmatpush3.bf16.msra.mxu0 %v2636_v4  ;;  %2649 = vmatprep.subr.bf16.mxu1 %v2640_v8  ;;  %v615_v44 = vld [vmem:[#allocation6 + $0x10] sm:$0xff]  ;;  %v1135_v45 = vld [vmem:[#allocation8 + $0x18] sm:$0xff]  ;;  %v1136_v47 = vld [vmem:[#allocation8 + $0x20] sm:$0xff] }
  0x48   :  { %2657 = vmatprep.subr.bf16.mxu0 %v2640_v8  ;;  %2480 = vmatmul.mubr.msk.f32.gmra.mrb[2].mxu0 %vm125_vm0, %v90_v13  ;;  %v616_v46 = vld [vmem:[#allocation6 + $0x18] sm:$0xff]  ;;  %v617_v48 = vld [vmem:[#allocation6 + $0x20] sm:$0xff]  ;;  %v1137_v49 = vld [vmem:[#allocation8 + $0x28] sm:$0xff] }
  0x49   :  { %2504 = vmatmul.mubr.msk.f32.gmra.mrb[2].mxu1 %vm125_vm0, %v106_v14  ;;  %2482 = vmatprep.mubr.msk.f32.mxu0 %vm125_vm0, %v91_v15  ;;  %v618_v50 = vld [vmem:[#allocation6 + $0x28] sm:$0xff]  ;;  %v1138_v51 = vld [vmem:[#allocation8 + $0x30] sm:$0xff]  ;;  %v1139_v53 = vld [vmem:[#allocation8 + $0x38] sm:$0xff] }
  0x4a   :  { %2506 = vmatprep.mubr.msk.f32.mxu1 %vm125_vm0, %v107_v16  ;;  %2651 = vmatpush3.bf16.msra.mxu1 %v2640_v8  ;;  %v619_v52 = vld [vmem:[#allocation6 + $0x30] sm:$0xff]  ;;  %v620_v54 = vld [vmem:[#allocation6 + $0x38] sm:$0xff]  ;;  %v1140_v55 = vld [vmem:[#allocation8 + $0x40] sm:$0xff] }
  0x4b   :  { %2659 = vmatpush3.bf16.msra.mxu0 %v2640_v8  ;;  %v621_v56 = vld [vmem:[#allocation6 + $0x40] sm:$0xff]  ;;  %v1141_v57 = vld [vmem:[#allocation8 + $0x48] sm:$0xff]  ;;  %v623_v59 = vld [vmem:[#allocation6 + $0x50] sm:$0xff] }
  0x4c   :  { %2483 = vmatmul.mubr.msk.f32.gmra.mrb[4].mxu0 %vm125_vm0, %v92_v17  ;;  %v622_v58 = vld [vmem:[#allocation6 + $0x48] sm:$0xff]  ;;  %v1142_v60 = vld [vmem:[#allocation8 + $0x50] sm:$0xff]  ;;  %v624_v61 = vld [vmem:[#allocation6 + $0x58] sm:$0xff] }
  0x4d   :  { %2507 = vmatmul.mubr.msk.f32.gmra.mrb[4].mxu1 %vm125_vm0, %v108_v18  ;;  %2485 = vmatprep.mubr.msk.f32.mxu0 %vm125_vm0, %v93_v19  ;;  %v1143_v62 = vld [vmem:[#allocation8 + $0x58] sm:$0xff]  ;;  %v625_v63 = vld [vmem:[#allocation6 + $0x60] sm:$0xff]  ;;  %v626_v1 = vld [vmem:[#allocation6 + $0x68] sm:$0xff] }
  0x4e   :  { %2509 = vmatprep.mubr.msk.f32.mxu1 %vm125_vm0, %v109_v20  ;;  %v1144_v0 = vld [vmem:[#allocation8 + $0x60] sm:$0xff]  ;;  %v1145_v2 = vld [vmem:[#allocation8 + $0x68] sm:$0xff]  ;;  %v1146_v3 = vld [vmem:[#allocation8 + $0x70] sm:$0xff] }
  0x4f   :  { %v627_v4 = vld [vmem:[#allocation6 + $0x70] sm:$0xff]  ;;  %v1147_v5 = vld [vmem:[#allocation8 + $0x78] sm:$0xff]  ;;  %v629_v7 = vld [vmem:[#allocation6 + $0x80] sm:$0xff] }
  0x50   :  { %2486 = vmatmul.mubr.msk.f32.gmra.mrb[6].mxu0 %vm125_vm0, %v94_v21  ;;  %v628_v6 = vld [vmem:[#allocation6 + $0x78] sm:$0xff]  ;;  %v1148_v8 = vld [vmem:[#allocation8 + $0x80] sm:$0xff]  ;;  %v630_v9 = vld [vmem:[#allocation6 + $0x88] sm:$0xff] }
  0x51   :  { %2510 = vmatmul.mubr.msk.f32.gmra.mrb[6].mxu1 %vm125_vm0, %v110_v22  ;;  %2488 = vmatprep.mubr.msk.f32.mxu0 %vm125_vm0, %v95_v23  ;;  %v1149_v10 = vld [vmem:[#allocation8 + $0x88] sm:$0xff]  ;;  %v1150_v11 = vld [vmem:[#allocation8 + $0x90] sm:$0xff]  ;;  %v1151_v13 = vld [vmem:[#allocation8 + $0x98] sm:$0xff] }
  0x52   :  { %2512 = vmatprep.mubr.msk.f32.mxu1 %vm125_vm0, %v111_v24  ;;  %v631_v12 = vld [vmem:[#allocation6 + $0x90] sm:$0xff]  ;;  %v632_v14 = vld [vmem:[#allocation6 + $0x98] sm:$0xff]  ;;  %v633_v15 = vld [vmem:[#allocation6 + $0xa0] sm:$0xff] }
  0x53   :  { %v1152_v16 = vld [vmem:[#allocation8 + $0xa0] sm:$0xff]  ;;  %v634_v17 = vld [vmem:[#allocation6 + $0xa8] sm:$0xff]  ;;  %v1154_v19 = vld [vmem:[#allocation8 + $0xb0] sm:$0xff] }
  0x54   :  { %2489 = vmatmul.mubr.msk.f32.gmra.mrb[8].mxu0 %vm125_vm0, %v96_v25  ;;  %v1153_v18 = vld [vmem:[#allocation8 + $0xa8] sm:$0xff]  ;;  %v635_v20 = vld [vmem:[#allocation6 + $0xb0] sm:$0xff]  ;;  %v1155_v21 = vld [vmem:[#allocation8 + $0xb8] sm:$0xff] }
  0x55   :  { %2513 = vmatmul.mubr.msk.f32.gmra.mrb[8].mxu1 %vm125_vm0, %v112_v26  ;;  %2491 = vmatprep.mubr.msk.f32.mxu0 %vm125_vm0, %v97_v27  ;;  %v636_v22 = vld [vmem:[#allocation6 + $0xb8] sm:$0xff]  ;;  %v1156_v23 = vld [vmem:[#allocation8 + $0xc0] sm:$0xff]  ;;  %v1157_v25 = vld [vmem:[#allocation8 + $0xc8] sm:$0xff] }
  0x56   :  { %2515 = vmatprep.mubr.msk.f32.mxu1 %vm125_vm0, %v113_v28  ;;  %v637_v24 = vld [vmem:[#allocation6 + $0xc0] sm:$0xff]  ;;  %v638_v26 = vld [vmem:[#allocation6 + $0xc8] sm:$0xff]  ;;  %v1158_v27 = vld [vmem:[#allocation8 + $0xd0] sm:$0xff] }
  0x57   :  { %v639_v28 = vld [vmem:[#allocation6 + $0xd0] sm:$0xff] }
  0x58   :  { %2492 = vmatmul.mubr.msk.f32.gmra.mrb[10].mxu0 %vm125_vm0, %v98_v29  ;;  %v1159_v29 = vld [vmem:[#allocation8 + $0xd8] sm:$0xff] }
  0x59   :  { %2516 = vmatmul.mubr.msk.f32.gmra.mrb[10].mxu1 %vm125_vm0, %v114_v30  ;;  %2494 = vmatprep.mubr.msk.f32.mxu0 %vm125_vm0, %v99_v31  ;;  %v640_v30 = vld [vmem:[#allocation6 + $0xd8] sm:$0xff]  ;;  %v641_v31 = vld [vmem:[#allocation6 + $0xe0] sm:$0xff] }
  0x5a   :  { %2518 = vmatprep.mubr.msk.f32.mxu1 %vm125_vm0, %v115_v32  ;;  %v1160_v32 = vld [vmem:[#allocation8 + $0xe0] sm:$0xff] }
  0x5c   :  { %2495 = vmatmul.mubr.msk.f32.gmra.mrb[12].mxu0 %vm125_vm0, %v100_v33  ;;  %v642_v33 = vld [vmem:[#allocation6 + $0xe8] sm:$0xff] }
  0x5d   :  { %2519 = vmatmul.mubr.msk.f32.gmra.mrb[12].mxu1 %vm125_vm0, %v116_v34  ;;  %2497 = vmatprep.mubr.msk.f32.mxu0 %vm125_vm0, %v101_v35  ;;  %v1161_v34 = vld [vmem:[#allocation8 + $0xe8] sm:$0xff]  ;;  %v643_v35 = vld [vmem:[#allocation6 + $0xf0] sm:$0xff] }
  0x5e   :  { %2521 = vmatprep.mubr.msk.f32.mxu1 %vm125_vm0, %v117_v36  ;;  %v1162_v36 = vld [vmem:[#allocation8 + $0xf0] sm:$0xff] }
  0x60   :  { %2498 = vmatmul.mubr.msk.f32.gmra.mrb[14].mxu0 %vm125_vm0, %v102_v37  ;;  %v644_v37 = vld [vmem:[#allocation6 + $0xf8] sm:$0xff] }
  0x61   :  { %2522 = vmatmul.mubr.msk.f32.gmra.mrb[14].mxu1 %vm125_vm0, %v118_v38  ;;  %2588 = vmatprep.mubr.msk.f32.mxu0 %vm125_vm0, %v1132_v40  ;;  %v1163_v38 = vld [vmem:[#allocation8 + $0xf8] sm:$0xff] }
  0x62   :  { %2532 = vmatprep.mubr.msk.f32.mxu1 %vm125_vm0, %v613_v39  ;;  %v2999_v39 = vld [vmem:[%s4120_s6] ss:$0 sm:$0xff] }
  0x64   :  { %2589 = vmatmul.mubr.msk.f32.vlgmr.msra.gmra.mrb[16].mxu0 %vm125_vm0, %v1133_v42 }
  0x65   :  { %2533 = vmatmul.mubr.msk.f32.vlgmr.msra.gmra.mrb[16].mxu1 %vm125_vm0, %v614_v41  ;;  %2591 = vmatprep.mubr.msk.f32.mxu0 %vm125_vm0, %v1134_v43 }
  0x66   :  { %2535 = vmatprep.mubr.msk.f32.mxu1 %vm125_vm0, %v615_v44 }
  0x68   :  { %2592 = vmatmul.mubr.msk.f32.gmra.mrb[18].mxu0 %vm125_vm0, %v1135_v45 }
  0x69   :  { %2536 = vmatmul.mubr.msk.f32.gmra.mrb[18].mxu1 %vm125_vm0, %v616_v46  ;;  %2594 = vmatprep.mubr.msk.f32.mxu0 %vm125_vm0, %v1136_v47 }
  0x6a   :  { %2538 = vmatprep.mubr.msk.f32.mxu1 %vm125_vm0, %v617_v48  ;;  %v3008_v48 = vld [vmem:[%s4121_s7] ss:$0 sm:$0xff] }
  0x6c   :  { %2595 = vmatmul.mubr.msk.f32.gmra.mrb[20].mxu0 %vm125_vm0, %v1137_v49 }
  0x6d   :  { %2539 = vmatmul.mubr.msk.f32.gmra.mrb[20].mxu1 %vm125_vm0, %v618_v50  ;;  %2597 = vmatprep.mubr.msk.f32.mxu0 %vm125_vm0, %v1138_v51 }
  0x6e   :  { %2541 = vmatprep.mubr.msk.f32.mxu1 %vm125_vm0, %v619_v52 }
  0x70   :  { %2598 = vmatmul.mubr.msk.f32.gmra.mrb[22].mxu0 %vm125_vm0, %v1139_v53 }
  0x71   :  { %2542 = vmatmul.mubr.msk.f32.gmra.mrb[22].mxu1 %vm125_vm0, %v620_v54  ;;  %2600 = vmatprep.mubr.msk.f32.mxu0 %vm125_vm0, %v1140_v55 }
  0x72   :  { %2544 = vmatprep.mubr.msk.f32.mxu1 %vm125_vm0, %v621_v56 }
  0x74   :  { %2601 = vmatmul.mubr.msk.f32.gmra.mrb[24].mxu0 %vm125_vm0, %v1141_v57 }
  0x75   :  { %2545 = vmatmul.mubr.msk.f32.gmra.mrb[24].mxu1 %vm125_vm0, %v622_v58  ;;  %2603 = vmatprep.mubr.msk.f32.mxu0 %vm125_vm0, %v1142_v60 }
  0x76   :  { %2547 = vmatprep.mubr.msk.f32.mxu1 %vm125_vm0, %v623_v59 }
  0x78   :  { %2604 = vmatmul.mubr.msk.f32.gmra.mrb[26].mxu0 %vm125_vm0, %v1143_v62 }
  0x79   :  { %2548 = vmatmul.mubr.msk.f32.gmra.mrb[26].mxu1 %vm125_vm0, %v624_v61  ;;  %2606 = vmatprep.mubr.msk.f32.mxu0 %vm125_vm0, %v1144_v0 }
  0x7a   :  { %2550 = vmatprep.mubr.msk.f32.mxu1 %vm125_vm0, %v625_v63 }
  0x7c   :  { %2607 = vmatmul.mubr.msk.f32.gmra.mrb[28].mxu0 %vm125_vm0, %v1145_v2 }
  0x7d   :  { %2551 = vmatmul.mubr.msk.f32.gmra.mrb[28].mxu1 %vm125_vm0, %v626_v1  ;;  %2609 = vmatprep.mubr.msk.f32.mxu0 %vm125_vm0, %v1146_v3 }
  0x7e   :  { %2553 = vmatprep.mubr.msk.f32.mxu1 %vm125_vm0, %v627_v4 }
  0x80   :  { %2610 = vmatmul.mubr.msk.f32.gmra.mrb[30].mxu0 %vm125_vm0, %v1147_v5 }
  0x81   :  { %2554 = vmatmul.mubr.msk.f32.gmra.mrb[30].mxu1 %vm125_vm0, %v628_v6  ;;  %2612 = vmatprep.mubr.msk.f32.mxu0 %vm125_vm0, %v1148_v8 }
  0x82   :  { %2556 = vmatprep.mubr.msk.f32.mxu1 %vm125_vm0, %v629_v7 }
  0x84   :  { %2613 = vmatmul.mubr.msk.f32.gmra.mrb[32].mxu0 %vm125_vm0, %v1149_v10 }
  0x85   :  { %2557 = vmatmul.mubr.msk.f32.gmra.mrb[32].mxu1 %vm125_vm0, %v630_v9  ;;  %2615 = vmatprep.mubr.msk.f32.mxu0 %vm125_vm0, %v1150_v11 }
  0x86   :  { %2559 = vmatprep.mubr.msk.f32.mxu1 %vm125_vm0, %v631_v12 }
  0x88   :  { %2616 = vmatmul.mubr.msk.f32.gmra.mrb[34].mxu0 %vm125_vm0, %v1151_v13 }
  0x89   :  { %2560 = vmatmul.mubr.msk.f32.gmra.mrb[34].mxu1 %vm125_vm0, %v632_v14  ;;  %2618 = vmatprep.mubr.msk.f32.mxu0 %vm125_vm0, %v1152_v16 }
  0x8a   :  { %2562 = vmatprep.mubr.msk.f32.mxu1 %vm125_vm0, %v633_v15 }
  0x8c   :  { %2619 = vmatmul.mubr.msk.f32.gmra.mrb[36].mxu0 %vm125_vm0, %v1153_v18 }
  0x8d   :  { %2563 = vmatmul.mubr.msk.f32.gmra.mrb[36].mxu1 %vm125_vm0, %v634_v17  ;;  %2621 = vmatprep.mubr.msk.f32.mxu0 %vm125_vm0, %v1154_v19 }
  0x8e   :  { %2565 = vmatprep.mubr.msk.f32.mxu1 %vm125_vm0, %v635_v20 }
  0x90   :  { %2622 = vmatmul.mubr.msk.f32.gmra.mrb[38].mxu0 %vm125_vm0, %v1155_v21 }
  0x91   :  { %2566 = vmatmul.mubr.msk.f32.gmra.mrb[38].mxu1 %vm125_vm0, %v636_v22  ;;  %2624 = vmatprep.mubr.msk.f32.mxu0 %vm125_vm0, %v1156_v23 }
  0x92   :  { %2568 = vmatprep.mubr.msk.f32.mxu1 %vm125_vm0, %v637_v24 }
  0x94   :  { %2625 = vmatmul.mubr.msk.f32.gmra.mrb[40].mxu0 %vm125_vm0, %v1157_v25 }
  0x95   :  { %2569 = vmatmul.mubr.msk.f32.gmra.mrb[40].mxu1 %vm125_vm0, %v638_v26  ;;  %2627 = vmatprep.mubr.msk.f32.mxu0 %vm125_vm0, %v1158_v27 }
  0x96   :  { %2571 = vmatprep.mubr.msk.f32.mxu1 %vm125_vm0, %v639_v28 }
  0x98   :  { %2628 = vmatmul.mubr.msk.f32.gmra.mrb[42].mxu0 %vm125_vm0, %v1159_v29 }
  0x99   :  { %2572 = vmatmul.mubr.msk.f32.gmra.mrb[42].mxu1 %vm125_vm0, %v640_v30  ;;  %2630 = vmatprep.mubr.msk.f32.mxu0 %vm125_vm0, %v1160_v32 }
  0x9a   :  { %2574 = vmatprep.mubr.msk.f32.mxu1 %vm125_vm0, %v641_v31 }
  0x9c   :  { %2631 = vmatmul.mubr.msk.f32.gmra.mrb[44].mxu0 %vm125_vm0, %v1161_v34 }
  0x9d   :  { %2575 = vmatmul.mubr.msk.f32.gmra.mrb[44].mxu1 %vm125_vm0, %v642_v33  ;;  %2633 = vmatprep.mubr.msk.f32.mxu0 %vm125_vm0, %v1162_v36 }
  0x9e   :  { %2577 = vmatprep.mubr.msk.f32.mxu1 %vm125_vm0, %v643_v35 }
  0xa0   :  { %2634 = vmatmul.mubr.msk.f32.gmra.mrb[46].mxu0 %vm125_vm0, %v1163_v38 }
  0xa1   :  { %2578 = vmatmul.mubr.msk.f32.gmra.mrb[46].mxu1 %vm125_vm0, %v644_v37 }
 0x117   :  { %v2478_v40 = vpop.f32.mrb[0].mxu0 }
 0x118   :  { %v2502_v41 = vpop.f32.mrb[0].mxu1  ;;  %v294_v42 = vadd.f32 %v2478_v40, %v2999_v39  ;;  %v288_v44 = vpop.f32.mrb[1].mxu0 }
 0x119   :  { %v374_v43 = vadd.f32 %v2502_v41, %v2999_v39  ;;  %v368_v45 = vpop.f32.mrb[1].mxu1  ;;  %v289_v46 = vadd.f32 %v2999_v39, %v288_v44 }
 0x11a   :  { %v369_v47 = vadd.f32 %v2999_v39, %v368_v45  ;;  %v448_v49 = vmax.f32 %v294_v42, 0.0 }
 0x11b   :  { %v464_v50 = vmax.f32 %v374_v43, 0.0  ;;  %v447_v51 = vmax.f32 %v289_v46, 0.0  ;;  %v2481_v52 = vpop.f32.mrb[2].mxu0 }
 0x11c   :  { %v2505_v53 = vpop.f32.mrb[2].mxu1  ;;  %v304_v54 = vadd.f32 %v2481_v52, %v2999_v39  ;;  %v298_v55 = vpop.f32.mrb[3].mxu0  ;;  %v486_v59 = vmul.f32 %v3008_v48, %v448_v49  ;;  %v463_v60 = vmax.f32 %v369_v47, 0.0 }
 0x11d   :  { %v384_v56 = vadd.f32 %v2505_v53, %v2999_v39  ;;  %v502_v57 = vmul.f32 %v3008_v48, %v464_v50  ;;  %v378_v58 = vpop.f32.mrb[3].mxu1  ;;  %v299_v61 = vadd.f32 %v2999_v39, %v298_v55  ;;  %v485_v63 = vmul.f32 %v3008_v48, %v447_v51 }
 0x11e   :  { %v379_v62 = vadd.f32 %v2999_v39, %v378_v58  ;;  %v450_v0 = vmax.f32 %v304_v54, 0.0  ;;  %v520_v3 = vsel %vm125_vm0, %v486_v59, 0.0  ;;  %v501_v12 = vmul.f32 %v3008_v48, %v463_v60 }
 0x11f   :  { %v466_v1 = vmax.f32 %v384_v56, 0.0  ;;  %v568_v2 = vsel %vm125_vm0, %v502_v57, 0.0  ;;  %521 = vadd.xlane.f32.xlu0 %v520_v3  ;;  %v2484_v4 = vpop.f32.mrb[4].mxu0  ;;  %v449_v13 = vmax.f32 %v299_v61, 0.0  ;;  %v517_v16 = vsel %vm125_vm0, %v485_v63, 0.0 }
 0x120   :  { %569 = vadd.xlane.f32.xlu1 %v568_v2  ;;  %v2508_v5 = vpop.f32.mrb[4].mxu1  ;;  %v488_v6 = vmul.f32 %v3008_v48, %v450_v0  ;;  %v314_v7 = vadd.f32 %v2484_v4, %v2999_v39  ;;  %v308_v9 = vpop.f32.mrb[5].mxu0  ;;  %v465_v14 = vmax.f32 %v379_v62, 0.0  ;;  %v565_v26 = vsel %vm125_vm0, %v501_v12, 0.0 }
 0x121   :  { %v504_v8 = vmul.f32 %v3008_v48, %v466_v1  ;;  %v388_v10 = vpop.f32.mrb[5].mxu1  ;;  %v309_v11 = vadd.f32 %v2999_v39, %v308_v9  ;;  %v394_v17 = vadd.f32 %v2508_v5, %v2999_v39  ;;  %v487_v27 = vmul.f32 %v3008_v48, %v449_v13 }
 0x122   :  { %v526_v15 = vsel %vm125_vm0, %v488_v6, 0.0  ;;  %v389_v18 = vadd.f32 %v2999_v39, %v388_v10  ;;  %v452_v21 = vmax.f32 %v314_v7, 0.0  ;;  %v503_v28 = vmul.f32 %v3008_v48, %v465_v14 }
 0x123   :  { %518 = vadd.xlane.f32.xlu0 %v517_v16  ;;  %v2487_v19 = vpop.f32.mrb[6].mxu0  ;;  %v574_v22 = vsel %vm125_vm0, %v504_v8, 0.0  ;;  %v451_v23 = vmax.f32 %v309_v11, 0.0  ;;  %v468_v29 = vmax.f32 %v394_v17, 0.0  ;;  %v523_v40 = vsel %vm125_vm0, %v487_v27, 0.0 }
 0x124   :  { %527 = vadd.xlane.f32.xlu1 %v526_v15  ;;  %v2511_v20 = vpop.f32.mrb[6].mxu1  ;;  %v318_v24 = vpop.f32.mrb[7].mxu0  ;;  %v467_v30 = vmax.f32 %v389_v18, 0.0  ;;  %v324_v33 = vadd.f32 %v2487_v19, %v2999_v39  ;;  %v490_v35 = vmul.f32 %v3008_v48, %v452_v21  ;;  %v571_v41 = vsel %vm125_vm0, %v503_v28, 0.0 }
 0x125   :  { %v398_v25 = vpop.f32.mrb[7].mxu1  ;;  %v319_v34 = vadd.f32 %v2999_v39, %v318_v24  ;;  %v489_v36 = vmul.f32 %v3008_v48, %v451_v23  ;;  %v404_v42 = vadd.f32 %v2511_v20, %v2999_v39  ;;  %v506_v44 = vmul.f32 %v3008_v48, %v468_v29 }
 0x126   :  { %v399_v43 = vadd.f32 %v2999_v39, %v398_v25  ;;  %v505_v45 = vmul.f32 %v3008_v48, %v467_v30  ;;  %v454_v49 = vmax.f32 %v324_v33, 0.0  ;;  %v532_v51 = vsel %vm125_vm0, %v490_v35, 0.0 }
 0x127   :  { %566 = vadd.xlane.f32.xlu0 %v565_v26  ;;  %v2490_v31 = vpop.f32.mrb[8].mxu0  ;;  %v453_v50 = vmax.f32 %v319_v34, 0.0  ;;  %v529_v52 = vsel %vm125_vm0, %v489_v36, 0.0  ;;  %v470_v55 = vmax.f32 %v404_v42, 0.0  ;;  %v580_v57 = vsel %vm125_vm0, %v506_v44, 0.0 }
 0x128   :  { %575 = vadd.xlane.f32.xlu1 %v574_v22  ;;  %v2514_v32 = vpop.f32.mrb[8].mxu1  ;;  %v328_v37 = vpop.f32.mrb[9].mxu0  ;;  %v469_v56 = vmax.f32 %v399_v43, 0.0  ;;  %v577_v58 = vsel %vm125_vm0, %v505_v45, 0.0  ;;  %v334_v61 = vadd.f32 %v2490_v31, %v2999_v39  ;;  %v492_v63 = vmul.f32 %v3008_v48, %v454_v49 }
 0x129   :  { %v408_v38 = vpop.f32.mrb[9].mxu1  ;;  %v329_v62 = vadd.f32 %v2999_v39, %v328_v37  ;;  %v491_v0 = vmul.f32 %v3008_v48, %v453_v50  ;;  %v414_v3 = vadd.f32 %v2514_v32, %v2999_v39  ;;  %v508_v5 = vmul.f32 %v3008_v48, %v470_v55 }
 0x12a   :  { %v409_v4 = vadd.f32 %v2999_v39, %v408_v38  ;;  %v507_v6 = vmul.f32 %v3008_v48, %v469_v56  ;;  %v456_v9 = vmax.f32 %v334_v61, 0.0  ;;  %v538_v11 = vsel %vm125_vm0, %v492_v63, 0.0 }
 0x12b   :  { %572 = vadd.xlane.f32.xlu0 %v571_v41  ;;  %v2493_v46 = vpop.f32.mrb[10].mxu0  ;;  %v455_v10 = vmax.f32 %v329_v62, 0.0  ;;  %v535_v12 = vsel %vm125_vm0, %v491_v0, 0.0  ;;  %v472_v15 = vmax.f32 %v414_v3, 0.0  ;;  %v586_v17 = vsel %vm125_vm0, %v508_v5, 0.0 }
 0x12c   :  { %524 = vadd.xlane.f32.xlu1 %v523_v40  ;;  %v2517_v47 = vpop.f32.mrb[10].mxu1  ;;  %v338_v53 = vpop.f32.mrb[11].mxu0  ;;  %v471_v16 = vmax.f32 %v409_v4, 0.0  ;;  %v583_v18 = vsel %vm125_vm0, %v507_v6, 0.0  ;;  %v344_v21 = vadd.f32 %v2493_v46, %v2999_v39  ;;  %v494_v23 = vmul.f32 %v3008_v48, %v456_v9 }
 0x12d   :  { %v418_v54 = vpop.f32.mrb[11].mxu1  ;;  %v339_v22 = vadd.f32 %v2999_v39, %v338_v53  ;;  %v493_v24 = vmul.f32 %v3008_v48, %v455_v10  ;;  %v424_v27 = vadd.f32 %v2517_v47, %v2999_v39  ;;  %v510_v29 = vmul.f32 %v3008_v48, %v472_v15 }
 0x12e   :  { %v419_v28 = vadd.f32 %v2999_v39, %v418_v54  ;;  %v509_v30 = vmul.f32 %v3008_v48, %v471_v16  ;;  %v458_v33 = vmax.f32 %v344_v21, 0.0  ;;  %v544_v35 = vsel %vm125_vm0, %v494_v23, 0.0 }
 0x12f   :  { %530 = vadd.xlane.f32.xlu0 %v529_v52  ;;  %v2496_v59 = vpop.f32.mrb[12].mxu0  ;;  %v457_v34 = vmax.f32 %v339_v22, 0.0  ;;  %v541_v36 = vsel %vm125_vm0, %v493_v24, 0.0  ;;  %v474_v40 = vmax.f32 %v424_v27, 0.0  ;;  %v592_v42 = vsel %vm125_vm0, %v510_v29, 0.0 }
 0x130   :  { %533 = vadd.xlane.f32.xlu1 %v532_v51  ;;  %v3046_v60 = vpop.f32.mrb[12].mxu1  ;;  %v348_v1 = vpop.f32.mrb[13].mxu0  ;;  %v473_v41 = vmax.f32 %v419_v28, 0.0  ;;  %v354_v43 = vadd.f32 %v2496_v59, %v2999_v39  ;;  %v589_v46 = vsel %vm125_vm0, %v509_v30, 0.0  ;;  %v496_v49 = vmul.f32 %v3008_v48, %v458_v33 }
 0x131   :  { %v428_v2 = vpop.f32.mrb[13].mxu1  ;;  %v349_v47 = vadd.f32 %v2999_v39, %v348_v1  ;;  %v495_v50 = vmul.f32 %v3008_v48, %v457_v34  ;;  %v434_v53 = vadd.f32 %v3046_v60, %v2999_v39  ;;  %v512_v56 = vmul.f32 %v3008_v48, %v474_v40 }
 0x132   :  { %v460_v54 = vmax.f32 %v354_v43, 0.0  ;;  %v429_v55 = vadd.f32 %v2999_v39, %v428_v2  ;;  %v550_v61 = vsel %vm125_vm0, %v496_v49, 0.0  ;;  %v511_v63 = vmul.f32 %v3008_v48, %v473_v41 }
 0x133   :  { %578 = vadd.xlane.f32.xlu0 %v577_v58  ;;  %v3056_v7 = vpop.f32.mrb[14].mxu0  ;;  %v459_v59 = vmax.f32 %v349_v47, 0.0  ;;  %v547_v62 = vsel %vm125_vm0, %v495_v50, 0.0  ;;  %v476_v1 = vmax.f32 %v434_v53, 0.0  ;;  %v598_v9 = vsel %vm125_vm0, %v512_v56, 0.0 }
 0x134   :  { %581 = vadd.xlane.f32.xlu1 %v580_v57  ;;  %v3058_v8 = vpop.f32.mrb[14].mxu1  ;;  %v3062_v13 = vpop.f32.mrb[15].mxu0  ;;  %v475_v2 = vmax.f32 %v429_v55, 0.0  ;;  %v364_v3 = vadd.f32 %v3056_v7, %v2999_v39  ;;  %v498_v4 = vmul.f32 %v3008_v48, %v460_v54  ;;  %v595_v10 = vsel %vm125_vm0, %v511_v63, 0.0 }
 0x135   :  { %v3064_v14 = vpop.f32.mrb[15].mxu1  ;;  %v444_v7 = vadd.f32 %v3058_v8, %v2999_v39  ;;  %v514_v21 = vmul.f32 %v3008_v48, %v476_v1 }
 0x136   :  { %v462_v23 = vmax.f32 %v364_v3, 0.0  ;;  %v556_v24 = vsel %vm125_vm0, %v498_v4, 0.0  ;;  %v513_v8 = vmul.f32 %v3008_v48, %v475_v2 }
 0x137   :  { %536 = vadd.xlane.f32.xlu0 %v535_v12  ;;  %v3070_v20 = vpop.f32.mrb[16].mxu0  ;;  %v497_v12 = vmul.f32 %v3008_v48, %v459_v59  ;;  %v478_v34 = vmax.f32 %v444_v7, 0.0 }
 0x138   :  { %539 = vadd.xlane.f32.xlu1 %v538_v11  ;;  %v3068_v19 = vpop.f32.mrb[16].mxu1  ;;  %v3076_v26 = vpop.f32.mrb[17].mxu0  ;;  %v359_v11 = vadd.f32 %v2999_v39, %v3062_v13  ;;  %v1332_v13 = vadd.f32 %v3070_v20, %v2999_v39  ;;  %v601_v43 = vsel %vm125_vm0, %v513_v8, 0.0 }
 0x139   :  { %v807_v25 = vpop.f32.mrb[17].mxu1  ;;  %v516_v56 = vmul.f32 %v3008_v48, %v478_v34 }
 0x13a   :  { %v808_v22 = vadd.f32 %v2999_v39, %v807_v25  ;;  %v461_v28 = vmax.f32 %v359_v11, 0.0  ;;  %v553_v25 = vsel %vm125_vm0, %v497_v12, 0.0  ;;  %v1486_v40 = vmax.f32 %v1332_v13, 0.0 }
 0x13b   :  { %584 = vadd.xlane.f32.xlu0 %v583_v18  ;;  %v3082_v31 = vpop.f32.mrb[18].mxu0  ;;  %v813_v18 = vadd.f32 %v3068_v19, %v2999_v39 }
 0x13c   :  { %587 = vadd.xlane.f32.xlu1 %v586_v17  ;;  %v3084_v32 = vpop.f32.mrb[18].mxu1  ;;  %v3088_v37 = vpop.f32.mrb[19].mxu0  ;;  %v439_v17 = vadd.f32 %v2999_v39, %v3064_v14  ;;  %v1327_v14 = vadd.f32 %v2999_v39, %v3076_v26  ;;  %v1342_v20 = vadd.f32 %v3082_v31, %v2999_v39  ;;  %v499_v50 = vmul.f32 %v3008_v48, %v461_v28 }
 0x13d   :  { %v3090_v38 = vpop.f32.mrb[19].mxu1  ;;  %v823_v29 = vadd.f32 %v3084_v32, %v2999_v39  ;;  %v967_v26 = vmax.f32 %v813_v18, 0.0  ;;  %v1337_v41 = vadd.f32 %v2999_v39, %v3088_v37  ;;  %v604_v32 = vsel %vm125_vm0, %v514_v21, 0.0 }
 0x13e   :  { %v818_v31 = vadd.f32 %v2999_v39, %v3090_v38  ;;  %v500_v37 = vmul.f32 %v3008_v48, %v462_v23  ;;  %v1488_v53 = vmax.f32 %v1342_v20, 0.0  ;;  %v559_v12 = vsel %vm125_vm0, %v499_v50, 0.0 }
 0x13f   :  { %542 = vadd.xlane.f32.xlu0 %v541_v36  ;;  %v3094_v44 = vpop.f32.mrb[20].mxu0  ;;  %v966_v36 = vmax.f32 %v808_v22, 0.0  ;;  %v969_v54 = vmax.f32 %v823_v29, 0.0  ;;  %v610_v21 = vsel %vm125_vm0, %v516_v56, 0.0 }
 0x140   :  { %545 = vadd.xlane.f32.xlu1 %v544_v35  ;;  %v3096_v45 = vpop.f32.mrb[20].mxu1  ;;  %v3102_v51 = vpop.f32.mrb[21].mxu0  ;;  %v477_v35 = vmax.f32 %v439_v17, 0.0  ;;  %v968_v1 = vmax.f32 %v818_v31, 0.0  ;;  %v1352_v3 = vadd.f32 %v3094_v44, %v2999_v39  ;;  %v562_v11 = vsel %vm125_vm0, %v500_v37, 0.0 }
 0x141   :  { %v3104_v52 = vpop.f32.mrb[21].mxu1  ;;  %v3211_v22 = vadd.f32 %v2999_v39, %v3102_v51 }
 0x142   :  { %v515_v59 = vmul.f32 %v3008_v48, %v477_v35  ;;  %v3215_v13 = vadd.f32 %v2999_v39, %v3104_v52 }
 0x143   :  { %590 = vadd.xlane.f32.xlu0 %v589_v46  ;;  %v3110_v57 = vpop.f32.mrb[22].mxu0  ;;  %v1485_v46 = vmax.f32 %v1327_v14, 0.0  ;;  %v1489_v31 = vmax.f32 %v3211_v22, 0.0 }
 0x144   :  { %593 = vadd.xlane.f32.xlu1 %v592_v42  ;;  %v3112_v58 = vpop.f32.mrb[22].mxu1  ;;  %v3117_v0 = vpop.f32.mrb[23].mxu0  ;;  %v3169_v42 = vld [vmem:[%s4122_s8] ss:$0 sm:$0xff]  ;;  %v3245_v56 = vadd.f32 %v3110_v57, %v2999_v39 }
 0x145   :  { %v3119_v60 = vpop.f32.mrb[23].mxu1  ;;  %v1004_v63 = vmul.f32 %v3169_v42, %v966_v36  ;;  %v1518_v2 = vmul.f32 %v3169_v42, %v1486_v40  ;;  %v1517_v4 = vmul.f32 %v3169_v42, %v1485_v46  ;;  %v1520_v7 = vmul.f32 %v3169_v42, %v1488_v53 }
 0x146   :  { %v1007_v17 = vmul.f32 %v3169_v42, %v969_v54  ;;  %v1006_v14 = vmul.f32 %v3169_v42, %v968_v1 }
 0x147   :  { %548 = vadd.xlane.f32.xlu0 %v547_v62  ;;  %v3124_v5 = vpop.f32.mrb[24].mxu0  ;;  %v1487_v62 = vmax.f32 %v1337_v41, 0.0  ;;  %v1036_v28 = vsel %vm125_vm0, %v1004_v63, 0.0  ;;  %v1549_v51 = vsel %vm125_vm0, %v1517_v4, 0.0  ;;  %v3226_v34 = vsel %vm125_vm0, %v1520_v7, 0.0 }
 0x148   :  { %551 = vadd.xlane.f32.xlu1 %v550_v61  ;;  %v3126_v6 = vpop.f32.mrb[24].mxu1  ;;  %v3133_v15 = vpop.f32.mrb[25].mxu0  ;;  %v1005_v61 = vmul.f32 %v3169_v42, %v967_v26  ;;  %v3229_v35 = vsel %vm125_vm0, %v1007_v17, 0.0  ;;  %v3241_v50 = vsel %vm125_vm0, %v1006_v14, 0.0  ;;  %v3273_v14 = vadd.f32 %v2999_v39, %v3119_v60 }
 0x149   :  { %v3135_v16 = vpop.f32.mrb[25].mxu1  ;;  %v1519_v8 = vmul.f32 %v3169_v42, %v1487_v62 }
 0x14a   :  { %v1039_v23 = vsel %vm125_vm0, %v1005_v61, 0.0 }
 0x14b   :  { %596 = vadd.xlane.f32.xlu0 %v595_v10  ;;  %v3153_v19 = vpop.f32.mrb[26].mxu0  ;;  %v3238_v37 = vsel %vm125_vm0, %v1519_v8, 0.0  ;;  %v1357_v8 = vadd.f32 %v2999_v39, %v3117_v0 }
 0x14c   :  { %599 = vadd.xlane.f32.xlu1 %v598_v9  ;;  %v3151_v27 = vpop.f32.mrb[26].mxu1  ;;  %v3162_v33 = vpop.f32.mrb[27].mxu0  ;;  %v833_v9 = vadd.f32 %v3096_v45, %v2999_v39  ;;  %v607_v45 = vsel %vm125_vm0, %v515_v59, 0.0  ;;  %v3249_v59 = vadd.f32 %v3112_v58, %v2999_v39 }
 0x14d   :  { %v3160_v30 = vpop.f32.mrb[27].mxu1 }
 0x14e   :  { %v971_v20 = vmax.f32 %v833_v9, 0.0 }
 0x14f   :  { %554 = vadd.xlane.f32.xlu0 %v553_v25  ;;  %v3177_v49 = vpop.f32.mrb[28].mxu0  ;;  %v1490_v25 = vmax.f32 %v1352_v3, 0.0 }
 0x150   :  { %557 = vadd.xlane.f32.xlu1 %v556_v24  ;;  %v3175_v47 = vpop.f32.mrb[28].mxu1  ;;  %v3183_v38 = vpop.f32.mrb[29].mxu0  ;;  %v3219_v24 = vsel %vm125_vm0, %v1518_v2, 0.0 }
 0x151   :  { %v3181_v55 = vpop.f32.mrb[29].mxu1 }
 0x153   :  { %602 = vadd.xlane.f32.xlu0 %v601_v43  ;;  %v3195_v10 = vpop.f32.mrb[30].mxu0 }
 0x154   :  { %605 = vadd.xlane.f32.xlu1 %v604_v32  ;;  %v3197_v48 = vpop.f32.mrb[30].mxu1  ;;  %v3203_v18 = vpop.f32.mrb[31].mxu0  ;;  %v970_v32 = vmax.f32 %v3215_v13, 0.0 }
 0x155   :  { %v3205_v44 = vpop.f32.mrb[31].mxu1 }
 0x157   :  { %560 = vadd.xlane.f32.xlu0 %v559_v12  ;;  %v2614_v52 = vpop.f32.mrb[32].mxu0 }
 0x158   :  { %563 = vadd.xlane.f32.xlu1 %v562_v11  ;;  %v2558_v29 = vpop.f32.mrb[32].mxu1  ;;  %v1412_v40 = vadd.f32 %v2614_v52, %v2999_v39  ;;  %v1406_v41 = vpop.f32.mrb[33].mxu0 }
 0x159   :  { %v893_v26 = vadd.f32 %v2558_v29, %v2999_v39  ;;  %v887_v36 = vpop.f32.mrb[33].mxu1  ;;  %v1407_v46 = vadd.f32 %v2999_v39, %v1406_v41 }
 0x15a   :  { %v888_v43 = vadd.f32 %v2999_v39, %v887_v36  ;;  %v1502_v54 = vmax.f32 %v1412_v40, 0.0 }
 0x15b   :  { %v983_v53 = vmax.f32 %v893_v26, 0.0  ;;  %608 = vadd.xlane.f32.xlu0 %v607_v45  ;;  %v1501_v62 = vmax.f32 %v1407_v46, 0.0  ;;  %v2617_v63 = vpop.f32.mrb[34].mxu0  ;;  %v1522_v45 = vmul.f32 %v3169_v42, %v1490_v25 }
 0x15c   :  { %611 = vadd.xlane.f32.xlu1 %v610_v21  ;;  %v982_v61 = vmax.f32 %v888_v43, 0.0  ;;  %v2561_v1 = vpop.f32.mrb[34].mxu1  ;;  %v1422_v2 = vadd.f32 %v2617_v63, %v2999_v39  ;;  %v1416_v4 = vpop.f32.mrb[35].mxu0  ;;  %v3257_v57 = vmul.f32 %v3169_v42, %v1502_v54  ;;  %v1009_v21 = vmul.f32 %v3169_v42, %v971_v20 }
 0x15d   :  { %v903_v3 = vadd.f32 %v2561_v1, %v2999_v39  ;;  %v3254_v9 = vmul.f32 %v3169_v42, %v983_v53  ;;  %v897_v11 = vpop.f32.mrb[35].mxu1  ;;  %v1417_v12 = vadd.f32 %v2999_v39, %v1416_v4  ;;  %v3265_v17 = vmul.f32 %v3169_v42, %v1501_v62 }
 0x15e   :  { %v3261_v58 = vmul.f32 %v3169_v42, %v982_v61  ;;  %v898_v7 = vadd.f32 %v2999_v39, %v897_v11  ;;  %v1504_v22 = vmax.f32 %v1422_v2, 0.0  ;;  %v3292_v53 = vmul.f32 %v3169_v42, %v970_v32 }
 0x15f   :  { %v985_v13 = vmax.f32 %v903_v3, 0.0  ;;  %1037 = vadd.xlane.f32.xlu0 %v1036_v28  ;;  %v1503_v29 = vmax.f32 %v1417_v12, 0.0  ;;  %v2620_v36 = vpop.f32.mrb[36].mxu0  ;;  %v3295_v54 = vmul.f32 %v3169_v42, %v1489_v31  ;;  %v1492_v63 = vmax.f32 %v3245_v56, 0.0 }
 0x160   :  { %1040 = vadd.xlane.f32.xlu1 %v1039_v23  ;;  %v984_v52 = vmax.f32 %v898_v7, 0.0  ;;  %v2564_v26 = vpop.f32.mrb[36].mxu1  ;;  %v1432_v20 = vadd.f32 %v2620_v36, %v2999_v39  ;;  %v1426_v41 = vpop.f32.mrb[37].mxu0  ;;  %v3278_v23 = vmul.f32 %v3169_v42, %v1504_v22  ;;  %v3300_v1 = vsel %vm125_vm0, %v1009_v21, 0.0 }
 0x161   :  { %v913_v40 = vadd.f32 %v2564_v26, %v2999_v39  ;;  %v907_v25 = vpop.f32.mrb[37].mxu1  ;;  %v3281_v28 = vmul.f32 %v3169_v42, %v985_v13  ;;  %v1427_v60 = vadd.f32 %v2999_v39, %v1426_v41  ;;  %v3286_v43 = vmul.f32 %v3169_v42, %v1503_v29 }
 0x162   :  { %v908_v0 = vadd.f32 %v2999_v39, %v907_v25  ;;  %v3289_v46 = vmul.f32 %v3169_v42, %v984_v52  ;;  %v1506_v62 = vmax.f32 %v1432_v20, 0.0  ;;  %v1491_v29 = vmax.f32 %v1357_v8, 0.0 }
 0x163   :  { %v987_v61 = vmax.f32 %v913_v40, 0.0  ;;  %1550 = vadd.xlane.f32.xlu0 %v1549_v51  ;;  %v1505_v3 = vmax.f32 %v1427_v60, 0.0  ;;  %v2623_v4 = vpop.f32.mrb[38].mxu0  ;;  %v3319_v52 = vsel %vm125_vm0, %v1522_v45, 0.0  ;;  %v1372_v40 = vadd.f32 %v3124_v5, %v2999_v39 }
 0x164   :  { %1553 = vadd.xlane.f32.xlu1 %v3219_v24  ;;  %v986_v2 = vmax.f32 %v908_v0, 0.0  ;;  %v2567_v11 = vpop.f32.mrb[38].mxu1  ;;  %v1442_v32 = vadd.f32 %v2623_v4, %v2999_v39  ;;  %v1436_v12 = vpop.f32.mrb[39].mxu0  ;;  %v3308_v24 = vmul.f32 %v3169_v42, %v1506_v62  ;;  %v1524_v20 = vmul.f32 %v3169_v42, %v1492_v63 }
 0x165   :  { %v923_v31 = vadd.f32 %v2567_v11, %v2999_v39  ;;  %v917_v7 = vpop.f32.mrb[39].mxu1  ;;  %v3305_v22 = vmul.f32 %v3169_v42, %v987_v61  ;;  %v1437_v51 = vadd.f32 %v2999_v39, %v1436_v12  ;;  %v3316_v13 = vmul.f32 %v3169_v42, %v1505_v3 }
 0x166   :  { %v918_v56 = vadd.f32 %v2999_v39, %v917_v7  ;;  %v3313_v21 = vmul.f32 %v3169_v42, %v986_v2  ;;  %v1508_v26 = vmax.f32 %v1442_v32, 0.0  ;;  %v848_v4 = vadd.f32 %v2999_v39, %v3135_v16 }
 0x167   :  { %v989_v36 = vmax.f32 %v923_v31, 0.0  ;;  %1046 = vadd.xlane.f32.xlu0 %v3229_v35  ;;  %v1507_v25 = vmax.f32 %v1437_v51, 0.0  ;;  %v2626_v0 = vpop.f32.mrb[40].mxu0  ;;  %v1523_v11 = vmul.f32 %v3169_v42, %v1491_v29  ;;  %v1494_v31 = vmax.f32 %v1372_v40, 0.0 }
 0x168   :  { %1559 = vadd.xlane.f32.xlu1 %v3226_v34  ;;  %v988_v41 = vmax.f32 %v918_v56, 0.0  ;;  %v2570_v60 = vpop.f32.mrb[40].mxu1  ;;  %v1452_v8 = vadd.f32 %v2626_v0, %v2999_v39  ;;  %v1446_v61 = vpop.f32.mrb[41].mxu0  ;;  %v3332_v34 = vmul.f32 %v3169_v42, %v1508_v26  ;;  %v1570_v7 = vsel %vm125_vm0, %v1524_v20, 0.0 }
 0x169   :  { %v933_v45 = vadd.f32 %v2570_v60, %v2999_v39  ;;  %v927_v62 = vpop.f32.mrb[41].mxu1  ;;  %v3329_v2 = vmul.f32 %v3169_v42, %v989_v36  ;;  %v1447_v5 = vadd.f32 %v2999_v39, %v1446_v61  ;;  %v3340_v3 = vmul.f32 %v3169_v42, %v1507_v25 }
 0x16a   :  { %v928_v35 = vadd.f32 %v2999_v39, %v927_v62  ;;  %v3337_v63 = vmul.f32 %v3169_v42, %v988_v41  ;;  %v1510_v32 = vmax.f32 %v1452_v8, 0.0  ;;  %v974_v8 = vmax.f32 %v848_v4, 0.0 }
 0x16b   :  { %v991_v12 = vmax.f32 %v933_v45, 0.0  ;;  %1043 = vadd.xlane.f32.xlu0 %v3241_v50  ;;  %v1509_v51 = vmax.f32 %v1447_v5, 0.0  ;;  %v2629_v26 = vpop.f32.mrb[42].mxu0  ;;  %v1567_v61 = vsel %vm125_vm0, %v1523_v11, 0.0  ;;  %v863_v5 = vadd.f32 %v3151_v27, %v2999_v39 }
 0x16c   :  { %1556 = vadd.xlane.f32.xlu1 %v3238_v37  ;;  %v990_v56 = vmax.f32 %v928_v35, 0.0  ;;  %v2573_v36 = vpop.f32.mrb[42].mxu1  ;;  %v1462_v25 = vadd.f32 %v2629_v26, %v2999_v39  ;;  %v1456_v41 = vpop.f32.mrb[43].mxu0  ;;  %v3350_v16 = vmul.f32 %v3169_v42, %v1510_v32  ;;  %v1526_v35 = vmul.f32 %v3169_v42, %v1494_v31 }
 0x16d   :  { %v943_v29 = vadd.f32 %v2573_v36, %v2999_v39  ;;  %v3354_v0 = vmul.f32 %v3169_v42, %v991_v12  ;;  %v937_v37 = vpop.f32.mrb[43].mxu1  ;;  %v1457_v50 = vadd.f32 %v2999_v39, %v1456_v41  ;;  %v3362_v60 = vmul.f32 %v3169_v42, %v1509_v51 }
 0x16e   :  { %v3358_v40 = vmul.f32 %v3169_v42, %v990_v56  ;;  %v938_v20 = vadd.f32 %v2999_v39, %v937_v37  ;;  %v1512_v45 = vmax.f32 %v1462_v25, 0.0  ;;  %v1012_v37 = vmul.f32 %v3169_v42, %v974_v8 }
 0x16f   :  { %v993_v62 = vmax.f32 %v943_v29, 0.0  ;;  %1052 = vadd.xlane.f32.xlu0 %v3300_v1  ;;  %v1511_v32 = vmax.f32 %v1457_v50, 0.0  ;;  %v2632_v26 = vpop.f32.mrb[44].mxu0  ;;  %v1382_v29 = vadd.f32 %v3153_v19, %v2999_v39 }
 0x170   :  { %1571 = vadd.xlane.f32.xlu1 %v1570_v7  ;;  %v992_v12 = vmax.f32 %v938_v20, 0.0  ;;  %v2576_v56 = vpop.f32.mrb[44].mxu1  ;;  %v3370_v51 = vmul.f32 %v3169_v42, %v1512_v45  ;;  %v1472_v1 = vadd.f32 %v2632_v26, %v2999_v39  ;;  %v1466_v7 = vpop.f32.mrb[45].mxu0  ;;  %v977_v45 = vmax.f32 %v863_v5, 0.0 }
 0x171   :  { %v953_v4 = vadd.f32 %v2576_v56, %v2999_v39  ;;  %v947_v11 = vpop.f32.mrb[45].mxu1  ;;  %v3374_v36 = vmul.f32 %v3169_v42, %v993_v62  ;;  %v1467_v31 = vadd.f32 %v2999_v39, %v1466_v7  ;;  %v3380_v25 = vmul.f32 %v3169_v42, %v1511_v32 }
 0x172   :  { %v948_v27 = vadd.f32 %v2999_v39, %v947_v11  ;;  %v3383_v41 = vmul.f32 %v3169_v42, %v992_v12  ;;  %v1514_v20 = vmax.f32 %v1472_v1, 0.0  ;;  %v1576_v62 = vsel %vm125_vm0, %v1526_v35, 0.0 }
 0x173   :  { %v995_v50 = vmax.f32 %v953_v4, 0.0  ;;  %1565 = vadd.xlane.f32.xlu0 %v3319_v52  ;;  %v1513_v26 = vmax.f32 %v1467_v31, 0.0  ;;  %v2635_v11 = vpop.f32.mrb[46].mxu0  ;;  %v1048_v31 = vsel %vm125_vm0, %v3292_v53, 0.0 }
 0x174   :  { %1568 = vadd.xlane.f32.xlu1 %v1567_v61  ;;  %v994_v56 = vmax.f32 %v948_v27, 0.0  ;;  %v2579_v32 = vpop.f32.mrb[46].mxu1  ;;  %v3394_v7 = vmul.f32 %v3169_v42, %v1514_v20  ;;  %v1482_v61 = vadd.f32 %v2635_v11, %v2999_v39  ;;  %v1476_v4 = vpop.f32.mrb[47].mxu0  ;;  %v973_v27 = vmax.f32 %v3249_v59, 0.0 }
 0x175   :  { %v3391_v12 = vmul.f32 %v3169_v42, %v995_v50  ;;  %v963_v19 = vadd.f32 %v2579_v32, %v2999_v39  ;;  %v957_v8 = vpop.f32.mrb[47].mxu1  ;;  %v3403_v35 = vmul.f32 %v3169_v42, %v1513_v26  ;;  %v1477_v1 = vadd.f32 %v2999_v39, %v1476_v4 }
 0x176   :  { %v958_v52 = vadd.f32 %v2999_v39, %v957_v8  ;;  %v3400_v5 = vmul.f32 %v3169_v42, %v994_v56  ;;  %v1516_v20 = vmax.f32 %v1482_v61, 0.0  ;;  %v1496_v32 = vmax.f32 %v1382_v29, 0.0 }
 0x177   :  { %v997_v50 = vmax.f32 %v963_v19, 0.0  ;;  %1049 = vadd.xlane.f32.xlu0 %v1048_v31  ;;  %v1060_v11 = vsel %vm125_vm0, %v1012_v37, 0.0  ;;  %v1515_v56 = vmax.f32 %v1477_v1, 0.0  ;;  %v972_v59 = vmax.f32 %v3273_v14, 0.0 }
 0x178   :  { %4136 = vst [vmem:[#allocation13_spill] sm:$0xff] %v3400_v5  ;;  %1577 = vadd.xlane.f32.xlu1 %v1576_v62  ;;  %v996_v8 = vmax.f32 %v958_v52, 0.0  ;;  %v1015_v5 = vmul.f32 %v3169_v42, %v977_v45  ;;  %v3412_v26 = vmul.f32 %v3169_v42, %v1516_v20  ;;  %v2776_v29 = vmov 0  }
 0x179   :  { %v3415_v4 = vmul.f32 %v3169_v42, %v997_v50  ;;  %v3422_v62 = vmul.f32 %v3169_v42, %v1515_v56  ;;  %2672 = vset.pattern.permute.xlu0 %v2776_v29  ;;  %v853_v37 = vadd.f32 %v3126_v6, %v2999_v39  ;;  %v858_v45 = vadd.f32 %v2999_v39, %v3160_v30 }
 0x17a   :  { %v3419_v53 = vmul.f32 %v3169_v42, %v996_v8  ;;  %v1561_v19 = vsel %vm125_vm0, %v3295_v54, 0.0  ;;  %v1011_v61 = vmul.f32 %v3169_v42, %v973_v27  ;;  %v1069_v14 = vsel %vm125_vm0, %v1015_v5, 0.0 }
 0x17b   :  { %1562 = vadd.xlane.f32.xlu0 %v1561_v19  ;;  %v1528_v52 = vmul.f32 %v3169_v42, %v1496_v32  ;;  %v1367_v1 = vadd.f32 %v2999_v39, %v3133_v15  ;;  %v1010_v31 = vmul.f32 %v3169_v42, %v972_v59  ;;  %v975_v6 = vmax.f32 %v853_v37, 0.0 }
 0x17c   :  { %1061 = vadd.xlane.f32.xlu1 %v1060_v11  ;;  %v976_v50 = vmax.f32 %v858_v45, 0.0  ;;  %v1377_v30 = vadd.f32 %v2999_v39, %v3162_v33  ;;  %v1057_v54 = vsel %vm125_vm0, %v1011_v61, 0.0  ;;  %v873_v5 = vadd.f32 %v3175_v47, %v2999_v39 }
 0x17d   :  { %v1582_v27 = vsel %vm125_vm0, %v1528_v52, 0.0  ;;  %v1392_v20 = vadd.f32 %v3177_v49, %v2999_v39  ;;  %v1493_v15 = vmax.f32 %v1367_v1, 0.0  ;;  %v1054_v11 = vsel %vm125_vm0, %v1010_v31, 0.0 }
 0x17e   :  { %v1495_v32 = vmax.f32 %v1377_v30, 0.0  ;;  %v1014_v8 = vmul.f32 %v3169_v42, %v976_v50  ;;  %v1013_v33 = vmul.f32 %v3169_v42, %v975_v6  ;;  %v1387_v56 = vadd.f32 %v2999_v39, %v3183_v38 }
 0x17f   :  { %1058 = vadd.xlane.f32.xlu0 %v1057_v54  ;;  %v979_v59 = vmax.f32 %v873_v5, 0.0  ;;  %v1498_v29 = vmax.f32 %v1392_v20, 0.0  ;;  %v1525_v47 = vmul.f32 %v3169_v42, %v1493_v15  ;;  %v868_v49 = vadd.f32 %v2999_v39, %v3181_v55 }
 0x180   :  { %1070 = vadd.xlane.f32.xlu1 %v1069_v14  ;;  %v1066_v37 = vsel %vm125_vm0, %v1014_v8, 0.0  ;;  %v1063_v45 = vsel %vm125_vm0, %v1013_v33, 0.0  ;;  %v1527_v19 = vmul.f32 %v3169_v42, %v1495_v32  ;;  %v1497_v61 = vmax.f32 %v1387_v56, 0.0 }
 0x181   :  { %v1402_v14 = vadd.f32 %v3195_v10, %v2999_v39  ;;  %v883_v38 = vadd.f32 %v3197_v48, %v2999_v39  ;;  %v1017_v52 = vmul.f32 %v3169_v42, %v979_v59  ;;  %v1530_v1 = vmul.f32 %v3169_v42, %v1498_v29 }
 0x182   :  { %v978_v55 = vmax.f32 %v868_v49, 0.0  ;;  %v1579_v31 = vsel %vm125_vm0, %v1527_v19, 0.0  ;;  %v1573_v6 = vsel %vm125_vm0, %v1525_v47, 0.0  ;;  %v878_v50 = vadd.f32 %v2999_v39, %v3205_v44 }
 0x183   :  { %1055 = vadd.xlane.f32.xlu0 %v1054_v11  ;;  %v1529_v30 = vmul.f32 %v3169_v42, %v1497_v61  ;;  %v1500_v10 = vmax.f32 %v1402_v14, 0.0  ;;  %v981_v54 = vmax.f32 %v883_v38, 0.0  ;;  %v1075_v48 = vsel %vm125_vm0, %v1017_v52, 0.0 }
 0x184   :  { %1583 = vadd.xlane.f32.xlu1 %v1582_v27  ;;  %v1588_v27 = vsel %vm125_vm0, %v1530_v1, 0.0  ;;  %v1397_v5 = vadd.f32 %v2999_v39, %v3203_v18  ;;  %v1016_v20 = vmul.f32 %v3169_v42, %v978_v55  ;;  %v980_v15 = vmax.f32 %v878_v50, 0.0 }
 0x185   :  { %v1585_v32 = vsel %vm125_vm0, %v1529_v30, 0.0  ;;  %v1532_v44 = vmul.f32 %v3169_v42, %v1500_v10  ;;  %v1019_v11 = vmul.f32 %v3169_v42, %v981_v54  ;;  %v1087_v49 = vsel %vm125_vm0, %v3254_v9, 0.0 }
 0x186   :  { %v1499_v8 = vmax.f32 %v1397_v5, 0.0  ;;  %v1072_v33 = vsel %vm125_vm0, %v1016_v20, 0.0  ;;  %v1018_v18 = vmul.f32 %v3169_v42, %v980_v15  ;;  %v1606_v19 = vsel %vm125_vm0, %v3278_v23, 0.0 }
 0x187   :  { %1064 = vadd.xlane.f32.xlu0 %v1063_v45  ;;  %v1594_v56 = vsel %vm125_vm0, %v1532_v44, 0.0  ;;  %v1081_v39 = vsel %vm125_vm0, %v1019_v11, 0.0  ;;  %v1600_v45 = vsel %vm125_vm0, %v3257_v57, 0.0  ;;  %v1093_v61 = vsel %vm125_vm0, %v3281_v28, 0.0  ;;  %v4142_v11 = vld [vmem:[#allocation13_spill] sm:$0xff] }
 0x188   :  { %1067 = vadd.xlane.f32.xlu1 %v1066_v37  ;;  %v1531_v59 = vmul.f32 %v3169_v42, %v1499_v8  ;;  %v1078_v29 = vsel %vm125_vm0, %v1018_v18, 0.0  ;;  %v1084_v37 = vsel %vm125_vm0, %v3261_v58, 0.0  ;;  %v1597_v42 = vsel %vm125_vm0, %v3265_v17, 0.0 }
 0x189   :  { %v1090_v9 = vsel %vm125_vm0, %v3289_v46, 0.0  ;;  %v1603_v58 = vsel %vm125_vm0, %v3286_v43, 0.0  ;;  %v1099_v23 = vsel %vm125_vm0, %v3305_v22, 0.0  ;;  %v1612_v28 = vsel %vm125_vm0, %v3308_v24, 0.0 }
 0x18a   :  { %v1591_v47 = vsel %vm125_vm0, %v1531_v59, 0.0  ;;  %v1096_v43 = vsel %vm125_vm0, %v3313_v21, 0.0  ;;  %v1609_v38 = vsel %vm125_vm0, %v3316_v13, 0.0  ;;  %v1624_v24 = vsel %vm125_vm0, %v3350_v16, 0.0  ;;  %v2358_v59 = vld [vmem:[#allocation2] ss:$0 sm:$0xff] }
 0x18b   :  { %1574 = vadd.xlane.f32.xlu0 %v1573_v6  ;;  %v1102_v1 = vsel %vm125_vm0, %v3337_v63, 0.0  ;;  %v1108_v13 = vsel %vm125_vm0, %v3358_v40, 0.0  ;;  %v1630_v63 = vsel %vm125_vm0, %v3370_v51, 0.0  ;;  %v1111_v50 = vsel %vm125_vm0, %v3354_v0, 0.0 }
 0x18c   :  { %1580 = vadd.xlane.f32.xlu1 %v1579_v31  ;;  %v1615_v31 = vsel %vm125_vm0, %v3340_v3, 0.0  ;;  %v1105_v3 = vsel %vm125_vm0, %v3329_v2, 0.0  ;;  %v1621_v10 = vsel %vm125_vm0, %v3362_v60, 0.0  ;;  %v1117_v0 = vsel %vm125_vm0, %v3374_v36, 0.0 }
 0x18d   :  { %v1114_v60 = vsel %vm125_vm0, %v3383_v41, 0.0  ;;  %v1627_v5 = vsel %vm125_vm0, %v3380_v25, 0.0  ;;  %v1636_v41 = vsel %vm125_vm0, %v3394_v7, 0.0  ;;  %v1120_v8 = vsel %vm125_vm0, %v4142_v11, 0.0 }
 0x18e   :  { %v1129_v7 = vsel %vm125_vm0, %v3415_v4, 0.0 }
 0x18f   :  { %1589 = vadd.xlane.f32.xlu0 %v1588_v27 }
 0x190   :  { %1076 = vadd.xlane.f32.xlu1 %v1075_v48  ;;  %v1618_v48 = vsel %vm125_vm0, %v3332_v34, 0.0  ;;  %v1123_v34 = vsel %vm125_vm0, %v3391_v12, 0.0  ;;  %v1633_v12 = vsel %vm125_vm0, %v3403_v35, 0.0 }
 0x193   :  { %1586 = vadd.xlane.f32.xlu0 %v1585_v32 }
 0x194   :  { %1073 = vadd.xlane.f32.xlu1 %v1072_v33 }
 0x197   :  { %1082 = vadd.xlane.f32.xlu0 %v1081_v39 }
 0x198   :  { %1595 = vadd.xlane.f32.xlu1 %v1594_v56 }
 0x19b   :  { %1079 = vadd.xlane.f32.xlu0 %v1078_v29 }
 0x19c   :  { %1592 = vadd.xlane.f32.xlu1 %v1591_v47 }
 0x19f   :  { %1085 = vadd.xlane.f32.xlu0 %v1084_v37 }
 0x1a0   :  { %1088 = vadd.xlane.f32.xlu1 %v1087_v49  ;;  %v1126_v49 = vsel %vm125_vm0, %v3419_v53, 0.0 }
 0x1a3   :  { %1598 = vadd.xlane.f32.xlu0 %v1597_v42 }
 0x1a4   :  { %1601 = vadd.xlane.f32.xlu1 %v1600_v45  ;;  %v1639_v45 = vsel %vm125_vm0, %v3422_v62, 0.0 }
 0x1a7   :  { %1094 = vadd.xlane.f32.xlu0 %v1093_v61 }
 0x1a8   :  { %1607 = vadd.xlane.f32.xlu1 %v1606_v19  ;;  %v1642_v19 = vsel %vm125_vm0, %v3412_v26, 0.0 }
 0x1ab   :  { %1091 = vadd.xlane.f32.xlu0 %v1090_v9 }
 0x1ac   :  { %1604 = vadd.xlane.f32.xlu1 %v1603_v58  ;;  %v3499_v17 = vpop.xlane.xlu0 %521 }
 0x1ad   :  { %v3497_v57 = vpop.xlane.xlu1 %569 }
 0x1af   :  { %1613 = vadd.xlane.f32.xlu0 %v1612_v28 }
 0x1b0   :  { %1100 = vadd.xlane.f32.xlu1 %v1099_v23  ;;  %v3507_v46 = vpop.xlane.xlu0 %518 }
 0x1b1   :  { %v3505_v14 = vpop.xlane.xlu1 %527 }
 0x1b3   :  { %1610 = vadd.xlane.f32.xlu0 %v1609_v38 }
 0x1b4   :  { %1097 = vadd.xlane.f32.xlu1 %v1096_v43  ;;  %v3515_v22 = vpop.xlane.xlu0 %566 }
 0x1b5   :  { %v3513_v52 = vpop.xlane.xlu1 %575 }
 0x1b7   :  { %1103 = vadd.xlane.f32.xlu0 %v1102_v1 }
 0x1b8   :  { %1625 = vadd.xlane.f32.xlu1 %v1624_v24  ;;  %v3523_v21 = vpop.xlane.xlu0 %572 }
 0x1b9   :  { %v3521_v55 = vpop.xlane.xlu1 %524 }
 0x1bb   :  { %1616 = vadd.xlane.f32.xlu0 %v1615_v31 }
 0x1bc   :  { %1109 = vadd.xlane.f32.xlu1 %v1108_v13  ;;  %v3531_v16 = vpop.xlane.xlu0 %530 }
 0x1bd   :  { %v3529_v6 = vpop.xlane.xlu1 %533 }
 0x1bf   :  { %1112 = vadd.xlane.f32.xlu0 %v1111_v50 }
 0x1c0   :  { %1631 = vadd.xlane.f32.xlu1 %v1630_v63  ;;  %v3539_v40 = vpop.xlane.xlu0 %578 }
 0x1c1   :  { %v3537_v30 = vpop.xlane.xlu1 %581  ;;  %4138 = vst [vmem:[#allocation15_spill] sm:$0xff] %v3539_v40  ;;  %v1822_v40 = vlaneseq }
 0x1c2   :  { %4137 = vst [vmem:[#allocation14_spill] sm:$0xff] %v3537_v30 }
 0x1c3   :  { %1622 = vadd.xlane.f32.xlu0 %v1621_v10 }
 0x1c4   :  { %1106 = vadd.xlane.f32.xlu1 %v1105_v3  ;;  %v3547_v51 = vpop.xlane.xlu0 %536 }
 0x1c5   :  { %v3545_v54 = vpop.xlane.xlu1 %539 }
 0x1c7   :  { %1118 = vadd.xlane.f32.xlu0 %v1117_v0 }
 0x1c8   :  { %1619 = vadd.xlane.f32.xlu1 %v1618_v48  ;;  %v3555_v2 = vpop.xlane.xlu0 %584 }
 0x1c9   :  { %v3553_v27 = vpop.xlane.xlu1 %587  ;;  %4140 = vst [vmem:[#allocation17_spill] sm:$0xff] %v3555_v2 }
 0x1ca   :  { %4139 = vst [vmem:[#allocation16_spill] sm:$0xff] %v3553_v27 }
 0x1cb   :  { %1115 = vadd.xlane.f32.xlu0 %v1114_v60 }
 0x1cc   :  { %1628 = vadd.xlane.f32.xlu1 %v1627_v5  ;;  %v3563_v36 = vpop.xlane.xlu0 %542 }
 0x1cd   :  { %v3561_v20 = vpop.xlane.xlu1 %545 }
 0x1d0   :  { %1124 = vadd.xlane.f32.xlu1 %v1123_v34  ;;  %v3569_v32 = vpop.xlane.xlu0 %590 }
 0x1d1   :  { %v3567_v15 = vpop.xlane.xlu1 %593 }
 0x1d2   :  { %4141 = vst [vmem:[#allocation18_spill] sm:$0xff] %v3567_v15  ;;  %v1825_v15 = vshrl.u32 %v1822_v40, 7 }
 0x1d4   :  { %1637 = vadd.xlane.f32.xlu1 %v1636_v41  ;;  %v3573_v25 = vpop.xlane.xlu0 %548 }
 0x1d5   :  { %v552_v44 = vpop.xlane.xlu1 %551 }
 0x1d8   :  { %1121 = vadd.xlane.f32.xlu1 %v1120_v8  ;;  %v3579_v56 = vpop.xlane.xlu0 %596 }
 0x1d9   :  { %v3577_v33 = vpop.xlane.xlu1 %599  ;;  %4144 = vst [vmem:[#allocation19_spill] sm:$0xff] %v3579_v56  ;;  %v1823_v56 = vand.u32 127, %v1822_v40 }
 0x1da   :  { %4143 = vst [vmem:[#allocation13_spill] sm:$0xff] %v3577_v33 }
 0x1dc   :  { %1634 = vadd.xlane.f32.xlu1 %v1633_v12  ;;  %v3583_v18 = vpop.xlane.xlu0 %554 }
 0x1dd   :  { %v558_v39 = vpop.xlane.xlu1 %557 }
 0x1e0   :  { %1130 = vadd.xlane.f32.xlu1 %v1129_v7  ;;  %v3589_v47 = vpop.xlane.xlu0 %602 }
 0x1e1   :  { %v3587_v29 = vpop.xlane.xlu1 %605  ;;  %4146 = vst [vmem:[#allocation21_spill] sm:$0xff] %v3589_v47  ;;  %1691 = vperm.xlu0 %2672, %v2358_v59  }
 0x1e2   :  { %4145 = vst [vmem:[#allocation20_spill] sm:$0xff] %v3587_v29 }
 0x1e4   :  { %1127 = vadd.xlane.f32.xlu1 %v1126_v49  ;;  %v3593_v35 = vpop.xlane.xlu0 %560 }
 0x1e5   :  { %v564_v37 = vpop.xlane.xlu1 %563 }
 0x1e8   :  { %1640 = vadd.xlane.f32.xlu1 %v1639_v45  ;;  %v3599_v4 = vpop.xlane.xlu0 %608 }
 0x1e9   :  { %v3597_v42 = vpop.xlane.xlu1 %611  ;;  %4148 = vst [vmem:[#allocation23_spill] sm:$0xff] %v3599_v4 }
 0x1ea   :  { %4147 = vst [vmem:[#allocation22_spill] sm:$0xff] %v3597_v42 }
 0x1ec   :  { %1643 = vadd.xlane.f32.xlu1 %v1642_v19  ;;  %v1038_v9 = vpop.xlane.xlu0 %1037 }
 0x1ed   :  { %v3603_v61 = vpop.xlane.xlu1 %1040  ;;  %v3606_v53 = vadd.f32 %v1038_v9, %v3507_v46 }
 0x1ef   :  { %4149 = vst [vmem:[#allocation24_spill] sm:$0xff] %v3606_v53 }
 0x1f0   :  { %v1551_v23 = vpop.xlane.xlu0 %1550 }
 0x1f1   :  { %v3608_v58 = vpop.xlane.xlu1 %1553  ;;  %v3611_v62 = vadd.f32 %v1551_v23, %v3507_v46 }
 0x1f3   :  { %4150 = vst [vmem:[#allocation25_spill] sm:$0xff] %v3611_v62 }
 0x1f4   :  { %v1047_v43 = vpop.xlane.xlu0 %1046 }
 0x1f5   :  { %v1560_v28 = vpop.xlane.xlu1 %1559 }
 0x1f8   :  { %v1044_v24 = vpop.xlane.xlu0 %1043 }
 0x1f9   :  { %v1557_v38 = vpop.xlane.xlu1 %1556 }
 0x1fa   :  { %v3672_v40 = vadd.f32 %v1557_v38, %v3521_v55 }
 0x1fc   :  { %v3613_v13 = vpop.xlane.xlu0 %1052 }
 0x1fd   :  { %v1572_v1 = vpop.xlane.xlu1 %1571 }
 0x200   :  { %v3617_v31 = vpop.xlane.xlu0 %1565 }
 0x201   :  { %v3615_v26 = vpop.xlane.xlu1 %1568 }
 0x204   :  { %v3621_v50 = vpop.xlane.xlu0 %1049 }
 0x205   :  { %v3619_v63 = vpop.xlane.xlu1 %1577 }
 0x208   :  { %v3625_v10 = vpop.xlane.xlu0 %1562 }
 0x209   :  { %v3623_v3 = vpop.xlane.xlu1 %1061 }
 0x20c   :  { %v1059_v0 = vpop.xlane.xlu0 %1058 }
 0x20d   :  { %v1071_v46 = vpop.xlane.xlu1 %1070 }
 0x20e   :  { %v3627_v48 = vadd.f32 %v1071_v46, %v552_v44 }
 0x210   :  { %4151 = vst [vmem:[#allocation26_spill] sm:$0xff] %v3627_v48  ;;  %v1056_v5 = vpop.xlane.xlu0 %1055 }
 0x211   :  { %v1584_v60 = vpop.xlane.xlu1 %1583 }
 0x212   :  { %v3629_v34 = vadd.f32 %v1584_v60, %v552_v44 }
 0x214   :  { %4152 = vst [vmem:[#allocation27_spill] sm:$0xff] %v3629_v34  ;;  %v1065_v11 = vpop.xlane.xlu0 %1064 }
 0x215   :  { %v1068_v41 = vpop.xlane.xlu1 %1067 }
 0x216   :  { %v3715_v38 = vadd.f32 %v1068_v41, %v3573_v25 }
 0x218   :  { %v1575_v12 = vpop.xlane.xlu0 %1574 }
 0x219   :  { %v1581_v8 = vpop.xlane.xlu1 %1580 }
 0x21c   :  { %v1590_v59 = vpop.xlane.xlu0 %1589 }
 0x21d   :  { %v1077_v7 = vpop.xlane.xlu1 %1076  ;;  %v3633_v45 = vadd.f32 %v1590_v59, %v558_v39 }
 0x21e   :  { %v3631_v49 = vadd.f32 %v1077_v7, %v558_v39 }
 0x21f   :  { %4154 = vst [vmem:[#allocation29_spill] sm:$0xff] %v3633_v45 }
 0x220   :  { %4153 = vst [vmem:[#allocation28_spill] sm:$0xff] %v3631_v49  ;;  %v1587_v9 = vpop.xlane.xlu0 %1586 }
 0x221   :  { %v1074_v19 = vpop.xlane.xlu1 %1073 }
 0x224   :  { %v1083_v42 = vpop.xlane.xlu0 %1082 }
 0x225   :  { %v1596_v23 = vpop.xlane.xlu1 %1595  ;;  %v3637_v48 = vadd.f32 %v1083_v42, %v564_v37 }
 0x226   :  { %v3635_v46 = vadd.f32 %v1596_v23, %v564_v37 }
 0x227   :  { %4156 = vst [vmem:[#allocation31_spill] sm:$0xff] %v3637_v48 }
 0x228   :  { %4155 = vst [vmem:[#allocation30_spill] sm:$0xff] %v3635_v46  ;;  %v1080_v60 = vpop.xlane.xlu0 %1079 }
 0x229   :  { %v1593_v44 = vpop.xlane.xlu1 %1592 }
 0x22c   :  { %v1086_v4 = vpop.xlane.xlu0 %1085 }
 0x22d   :  { %v1089_v34 = vpop.xlane.xlu1 %1088 }
 0x230   :  { %v1599_v53 = vpop.xlane.xlu0 %1598 }
 0x231   :  { %v1602_v62 = vpop.xlane.xlu1 %1601 }
 0x234   :  { %v1095_v2 = vpop.xlane.xlu0 %1094 }
 0x235   :  { %v1608_v27 = vpop.xlane.xlu1 %1607 }
 0x238   :  { %v1092_v49 = vpop.xlane.xlu0 %1091 }
 0x239   :  { %v1605_v7 = vpop.xlane.xlu1 %1604 }
 0x23c   :  { %v3639_v59 = vpop.xlane.xlu0 %1613 }
 0x23d   :  { %v1101_v39 = vpop.xlane.xlu1 %1100  ;;  %4157 = vst [vmem:[#allocation32_spill] sm:$0xff] %v3639_v59 }
 0x240   :  { %v3643_v47 = vpop.xlane.xlu0 %1610 }
 0x241   :  { %v3641_v45 = vpop.xlane.xlu1 %1097  ;;  %4159 = vst [vmem:[#allocation34_spill] sm:$0xff] %v3643_v47  ;;  %v3657_v47 = vadd.f32 %v3603_v61, %v3499_v17  ;;  %v3678_v61 = vadd.f32 %v1572_v1, %v3545_v54  ;;  %v3721_v1 = vadd.f32 %v1581_v8, %v3573_v25  ;;  %v3739_v25 = vadd.f32 %v1089_v34, %v3497_v57 }
 0x242   :  { %4158 = vst [vmem:[#allocation33_spill] sm:$0xff] %v3641_v45 }
 0x243   :  { %4165 = vst [vmem:[#allocation40_spill] sm:$0xff] %v3657_v47 }
 0x244   :  { %v3645_v37 = vpop.xlane.xlu0 %1103 }
 0x245   :  { %v1626_v23 = vpop.xlane.xlu1 %1625  ;;  %4160 = vst [vmem:[#allocation35_spill] sm:$0xff] %v3645_v37  ;;  %v3661_v37 = vadd.f32 %v3608_v58, %v3499_v17  ;;  %v3682_v17 = vadd.f32 %v3613_v13, %v3529_v6  ;;  %v3702_v58 = vadd.f32 %v3623_v3, %v3563_v36  ;;  %v3724_v13 = vadd.f32 %v1575_v12, %v3563_v36 }
 0x246   :  { %v3742_v36 = vadd.f32 %v1086_v4, %v3515_v22  ;;  %v3754_v3 = vadd.f32 %v1095_v2, %v3513_v52 }
 0x248   :  { %v3647_v46 = vpop.xlane.xlu0 %1616 }
 0x249   :  { %v1110_v42 = vpop.xlane.xlu1 %1109  ;;  %4161 = vst [vmem:[#allocation36_spill] sm:$0xff] %v3647_v46  ;;  %v3664_v46 = vadd.f32 %v1560_v28, %v3505_v14  ;;  %v3706_v28 = vadd.f32 %v3625_v10, %v3531_v16  ;;  %v3760_v10 = vadd.f32 %v1092_v49, %v3523_v21  ;;  %v4170_v49 = vld [vmem:[#allocation13_spill] sm:$0xff] }
 0x24a   :  { %v1677_v4 = vadd.f32 %v1110_v42, %v3569_v32  ;;  %v4173_v42 = vld [vmem:[#allocation33_spill] sm:$0xff] }
 0x24c   :  { %v1113_v29 = vpop.xlane.xlu0 %1112 }
 0x24d   :  { %v3649_v48 = vpop.xlane.xlu1 %1631 }
 0x24e   :  { %4162 = vst [vmem:[#allocation37_spill] sm:$0xff] %v3649_v48  ;;  %v3666_v48 = vsub.s32 %v1823_v56, %v1825_v15  ;;  %v3686_v15 = vadd.f32 %v3615_v26, %v3547_v51  ;;  %v3698_v56 = vadd.f32 %v3621_v50, %v3531_v16  ;;  %v3727_v16 = vadd.f32 %v1074_v19, %v3583_v18 }
 0x24f   :  { %v3751_v50 = vadd.f32 %v1608_v27, %v3513_v52 }
 0x250   :  { %v1623_v30 = vpop.xlane.xlu0 %1622 }
 0x251   :  { %v3651_v33 = vpop.xlane.xlu1 %1106  ;;  %v1750_v52 = vadd.f32 %v1623_v30, %v3569_v32 }
 0x252   :  { %4163 = vst [vmem:[#allocation38_spill] sm:$0xff] %v3651_v33  ;;  %v3669_v33 = vadd.f32 %v1047_v43, %v3505_v14  ;;  %v3690_v14 = vadd.f32 %v3617_v31, %v3529_v6  ;;  %v3709_v43 = vadd.f32 %v1059_v0, %v3545_v54  ;;  %v3712_v6 = vadd.f32 %v1056_v5, %v3547_v51  ;;  %v4166_v0 = vld [vmem:[#allocation18_spill] sm:$0xff] }
 0x253   :  { %v3730_v54 = vadd.f32 %v1587_v9, %v3583_v18  ;;  %v3733_v51 = vadd.f32 %v1593_v44, %v3593_v35  ;;  %v3748_v18 = vadd.f32 %v1599_v53, %v3515_v22  ;;  %v4168_v22 = vld [vmem:[#allocation14_spill] sm:$0xff]  ;;  %v1751_v27 = vadd.f32 %v1626_v23, %v4166_v0  ;;  %v4172_v23 = vld [vmem:[#allocation15_spill] sm:$0xff] }
 0x254   :  { %v1119_v45 = vpop.xlane.xlu0 %1118  ;;  %v3766_v53 = vadd.f32 %v1101_v39, %v4168_v22 }
 0x255   :  { %v3653_v59 = vpop.xlane.xlu1 %1619  ;;  %v1680_v19 = vadd.f32 %v1119_v45, %v4170_v49 }
 0x256   :  { %4164 = vst [vmem:[#allocation39_spill] sm:$0xff] %v3653_v59  ;;  %v3675_v59 = vadd.f32 %v1044_v24, %v3521_v55  ;;  %v3694_v55 = vadd.f32 %v3619_v63, %v3561_v20  ;;  %v3718_v24 = vadd.f32 %v1065_v11, %v3561_v20  ;;  %v3736_v20 = vadd.f32 %v1080_v60, %v3593_v35 }
 0x257   :  { %v3745_v63 = vadd.f32 %v1602_v62, %v3497_v57  ;;  %v3757_v35 = vadd.f32 %v1605_v7, %v3523_v21  ;;  %v1678_v57 = vadd.f32 %v1113_v29, %v4166_v0  ;;  %v4167_v62 = vld [vmem:[#allocation19_spill] sm:$0xff]  ;;  %v4169_v21 = vld [vmem:[#allocation32_spill] sm:$0xff] }
 0x258   :  { %v1116_v26 = vpop.xlane.xlu0 %1115  ;;  %v3775_v11 = vadd.f32 %v4169_v21, %v4168_v22  ;;  %v4175_v22 = vld [vmem:[#allocation21_spill] sm:$0xff]  ;;  %v4176_v21 = vld [vmem:[#allocation34_spill] sm:$0xff] }
 0x259   :  { %v1629_v47 = vpop.xlane.xlu1 %1628  ;;  %v1679_v5 = vadd.f32 %v1116_v26, %v4167_v62  ;;  %v3791_v26 = vadd.f32 %v4173_v42, %v4172_v23 }
 0x25a   :  { %v1752_v2 = vadd.f32 %v1629_v47, %v4167_v62  ;;  %v4171_v47 = vld [vmem:[#allocation37_spill] sm:$0xff]  ;;  %v4174_v62 = vld [vmem:[#allocation20_spill] sm:$0xff] }
 0x25b   :  { %v1753_v44 = vadd.f32 %v4171_v47, %v4170_v49 }
 0x25d   :  { %v1125_v31 = vpop.xlane.xlu1 %1124 }
 0x260   :  { %v3771_v41 = vpop.permute.xlu0 %1691 }
 0x261   :  { %v1638_v34 = vpop.xlane.xlu1 %1637  ;;  %v1718_v29 = vadd.f32 %v3771_v41, %v1677_v4  ;;  %v1719_v8 = vadd.f32 %v3771_v41, %v1678_v57  ;;  %v1720_v12 = vadd.f32 %v3771_v41, %v1679_v5  ;;  %v1782_v9 = vadd.f32 %v1750_v52, %v3771_v41 }
 0x262   :  { %v1783_v30 = vadd.f32 %v1751_v27, %v3771_v41  ;;  %v1784_v32 = vadd.f32 %v1752_v2, %v3771_v41  ;;  %v1721_v4 = vadd.f32 %v3771_v41, %v1680_v19  ;;  %v1682_v5 = vadd.f32 %v1125_v31, %v4174_v62  ;;  %v4179_v19 = vld [vmem:[#allocation36_spill] sm:$0xff] }
 0x263   :  { %v1923_v60 = vrot.slane %v1718_v29, %v3666_v48  ;;  %v1927_v7 = vrot.slane %v1719_v8, %v3666_v48  ;;  %v1931_v39 = vrot.slane %v1720_v12, %v3666_v48  ;;  %v2126_v0 = vrot.slane %v1782_v9, %v3666_v48  ;;  %v4177_v8 = vld [vmem:[#allocation17_spill] sm:$0xff]  ;;  %v4178_v12 = vld [vmem:[#allocation35_spill] sm:$0xff] }
 0x264   :  { %v2130_v57 = vrot.slane %v1783_v30, %v3666_v48  ;;  %v3800_v2 = vadd.f32 %v1753_v44, %v3771_v41  ;;  %v3804_v29 = vadd.f32 %v4176_v21, %v4172_v23  ;;  %v3808_v49 = vadd.f32 %v4178_v12, %v4177_v8  ;;  %v4181_v23 = vld [vmem:[#allocation38_spill] sm:$0xff] }
 0x265   :  { %v1122_v45 = vpop.xlane.xlu1 %1121  ;;  %v1980_v52 = vsel %vm1952_vm1, %v1927_v7, %v1923_v60  ;;  %v3812_v9 = vadd.f32 %v4179_v19, %v4177_v8  ;;  %v2134_v31 = vrot.slane %v1784_v32, %v3666_v48  ;;  %v3819_v60 = vadd.f32 %v3771_v41, %v1682_v5  ;;  %v4180_v7 = vld [vmem:[#allocation16_spill] sm:$0xff] }
 0x266   :  { %v1681_v27 = vadd.f32 %v1122_v45, %v4175_v22  ;;  %v1981_v47 = vsel %vm1954_vm2, %v1931_v39, %v1980_v52  ;;  %v2176_v44 = vsel %vm1952_vm1, %v2130_v57, %v2126_v0  ;;  %v3823_v42 = vadd.f32 %v4181_v23, %v4180_v7  ;;  %v4182_v45 = vld [vmem:[#allocation39_spill] sm:$0xff]  ;;  %v4183_v57 = vld [vmem:[#allocation24_spill] sm:$0xff] }
 0x267   :  { %v3827_v21 = vadd.f32 %v4182_v45, %v4180_v7  ;;  %v3830_v8 = vadd.f32 %v1638_v34, %v4174_v62  ;;  %v1935_v32 = vrot.slane %v1721_v4, %v3666_v48  ;;  %v1694_v5 = vadd.f32 %v3771_v41, %v4183_v57  ;;  %v4184_v52 = vld [vmem:[#allocation40_spill] sm:$0xff] }
 0x268   :  { %v1722_v30 = vadd.f32 %v3771_v41, %v1681_v27  ;;  %v1695_v12 = vadd.f32 %v3771_v41, %v4184_v52  ;;  %v2177_v62 = vsel %vm1954_vm2, %v2134_v31, %v2176_v44  ;;  %v1696_v4 = vadd.f32 %v3771_v41, %v3675_v59  ;;  %v4185_v44 = vld [vmem:[#allocation25_spill] sm:$0xff] }
 0x269   :  { %v1635_v27 = vpop.xlane.xlu1 %1634  ;;  %v1982_v34 = vsel %vm1956_vm3, %v1935_v32, %v1981_v47  ;;  %v1697_v7 = vadd.f32 %v3771_v41, %v3669_v33  ;;  %v1698_v23 = vadd.f32 %v3771_v41, %v3698_v56  ;;  %v1700_v31 = vadd.f32 %v3771_v41, %v3712_v6 }
 0x26a   :  { %v1754_v39 = vadd.f32 %v1635_v27, %v4175_v22  ;;  %v1939_v19 = vrot.slane %v1722_v30, %v3666_v48  ;;  %v1943_v22 = vrot.slane %v3819_v60, %v3666_v48  ;;  %v1699_v30 = vadd.f32 %v3771_v41, %v3682_v17 }
 0x26b   :  { %v1758_v59 = vadd.f32 %v4185_v44, %v3771_v41  ;;  %v1759_v60 = vadd.f32 %v3661_v37, %v3771_v41  ;;  %v1760_v33 = vadd.f32 %v3672_v40, %v3771_v41  ;;  %v1701_v56 = vadd.f32 %v3771_v41, %v3709_v43 }
 0x26c   :  { %v1786_v45 = vadd.f32 %v1754_v39, %v3771_v41  ;;  %v1827_v17 = vrot.slane %v1694_v5, %v3666_v48  ;;  %v1831_v32 = vrot.slane %v1695_v12, %v3666_v48  ;;  %v1983_v6 = vsel %vm1958_vm4, %v1939_v19, %v1982_v34 }
 0x26d   :  { %v1131_v47 = vpop.xlane.xlu1 %1130  ;;  %v1761_v27 = vadd.f32 %v3664_v46, %v3771_v41  ;;  %v1762_v37 = vadd.f32 %v3706_v28, %v3771_v41  ;;  %v1835_v57 = vrot.slane %v1696_v4, %v3666_v48  ;;  %v1763_v40 = vadd.f32 %v3690_v14, %v3771_v41  ;;  %v4186_v14 = vld [vmem:[#allocation23_spill] sm:$0xff] }
 0x26e   :  { %v1764_v43 = vadd.f32 %v3686_v15, %v3771_v41  ;;  %v1765_v39 = vadd.f32 %v3678_v61, %v3771_v41  ;;  %v1839_v5 = vrot.slane %v1697_v7, %v3666_v48  ;;  %v1953_v12 = vsel %vm1952_vm1, %v1831_v32, %v1827_v17  ;;  %v4187_v61 = vld [vmem:[#allocation22_spill] sm:$0xff] }
 0x26f   :  { %v2030_v46 = vrot.slane %v1758_v59, %v3666_v48  ;;  %v2034_v28 = vrot.slane %v1759_v60, %v3666_v48  ;;  %v2038_v19 = vrot.slane %v1760_v33, %v3666_v48  ;;  %v2142_v34 = vrot.slane %v1786_v45, %v3666_v48 }
 0x270   :  { %v1843_v15 = vrot.slane %v1698_v23, %v3666_v48  ;;  %v1955_v44 = vsel %vm1954_vm2, %v1835_v57, %v1953_v12  ;;  %v1684_v0 = vadd.f32 %v1131_v47, %v4187_v61  ;;  %v1847_v7 = vrot.slane %v1699_v30, %v3666_v48 }
 0x271   :  { %v1128_v52 = vpop.xlane.xlu1 %1127  ;;  %v1851_v17 = vrot.slane %v1700_v31, %v3666_v48  ;;  %v1957_v59 = vsel %vm1956_vm3, %v1839_v5, %v1955_v44  ;;  %v2042_v45 = vrot.slane %v1761_v27, %v3666_v48  ;;  %v2155_v32 = vsel %vm1952_vm1, %v2034_v28, %v2030_v46  ;;  %v1645_v31 = vld [vmem:[%s4117_s3] sm:$0xff] }
 0x272   :  { %v1683_v4 = vadd.f32 %v1128_v52, %v4186_v14  ;;  %v1959_v33 = vsel %vm1958_vm4, %v1843_v15, %v1957_v59  ;;  %v1855_v23 = vrot.slane %v1701_v56, %v3666_v48  ;;  %v2046_v47 = vrot.slane %v1762_v37, %v3666_v48 }
 0x273   :  { %v1961_v57 = vsel %vm1960_vm5, %v1847_v7, %v1959_v33  ;;  %v2156_v30 = vsel %vm1954_vm2, %v2038_v19, %v2155_v32  ;;  %v2050_v12 = vrot.slane %v1763_v40, %v3666_v48  ;;  %v2054_v27 = vrot.slane %v1764_v43, %v3666_v48  ;;  %v1649_v40 = vld [vmem:[%s4118_s4] sm:$0xff] }
 0x274   :  { %v1724_v60 = vadd.f32 %v3771_v41, %v1683_v4  ;;  %v1963_v5 = vsel %vm1962_vm6, %v1851_v17, %v1961_v57  ;;  %v2157_v46 = vsel %vm1956_vm3, %v2042_v45, %v2156_v30  ;;  %v3911_v19 = vadd.f32 %v3830_v8, %v3771_v41  ;;  %v4190_v57 = vld [vmem:[#allocation28_spill] sm:$0xff] }
 0x275   :  { %v1641_v52 = vpop.xlane.xlu1 %1640  ;;  %v1965_v28 = vsel %vm1964_vm7, %v1855_v23, %v1963_v5  ;;  %v2158_v37 = vsel %vm1958_vm4, %v2046_v47, %v2157_v46  ;;  %v4188_v4 = vrot.slane %v3800_v2, %v3666_v48  ;;  %v2058_v43 = vrot.slane %v1765_v39, %v3666_v48 }
 0x276   :  { %v1947_v56 = vrot.slane %v1724_v60, %v3666_v48  ;;  %v2159_v44 = vsel %vm1960_vm5, %v2050_v12, %v2158_v37  ;;  %v1756_v7 = vadd.f32 %v1641_v52, %v4186_v14  ;;  %v1984_v8 = vsel %vm1960_vm5, %v1943_v22, %v1983_v6 }
 0x277   :  { %v2178_v15 = vsel %vm1956_vm3, %v4188_v4, %v2177_v62  ;;  %v1991_v59 = vmul.f32 %v1965_v28, %v1645_v31  ;;  %v2160_v2 = vsel %vm1962_vm6, %v2054_v27, %v2159_v44  ;;  %v1702_v60 = vadd.f32 %v3771_v41, %v3702_v58  ;;  %v4189_v58 = vld [vmem:[#allocation26_spill] sm:$0xff] }
 0x278   :  { %v3924_v17 = vsel %vm1958_vm4, %v2142_v34, %v2178_v15  ;;  %v2161_v62 = vsel %vm1964_vm7, %v2058_v43, %v2160_v2  ;;  %v1703_v39 = vadd.f32 %v3771_v41, %v3718_v24  ;;  %v1704_v33 = vadd.f32 %v3771_v41, %v3715_v38 }
 0x279   :  { %v3936_v14 = vadd.f32 %v3771_v41, %v1684_v0  ;;  %v3939_v34 = vsel %vm1962_vm6, %v1947_v56, %v1984_v8  ;;  %v2187_v22 = vmul.f32 %v2161_v62, %v1649_v40  ;;  %v2146_v6 = vrot.slane %v3911_v19, %v3666_v48  ;;  %v1644_v15 = vpop.xlane.xlu1 %1643 }
 0x27a   :  { %v3944_v45 = vadd.f32 %v1756_v7, %v3771_v41  ;;  %v1705_v32 = vadd.f32 %v3771_v41, %v4189_v58  ;;  %v1766_v24 = vadd.f32 %v3724_v13, %v3771_v41  ;;  %v1767_v38 = vadd.f32 %v3694_v55, %v3771_v41  ;;  %v4191_v55 = vld [vmem:[#allocation31_spill] sm:$0xff]  ;;  %v4194_v7 = vld [vmem:[#allocation30_spill] sm:$0xff] }
 0x27b   :  { %v2191_v0 = vsub.f32 %v1991_v59, %v2187_v22  ;;  %v1706_v23 = vadd.f32 %v3771_v41, %v3727_v16  ;;  %v1707_v47 = vadd.f32 %v3771_v41, %v4190_v57  ;;  %v1768_v30 = vadd.f32 %v3721_v1, %v3771_v41  ;;  %v4192_v16 = vld [vmem:[#allocation27_spill] sm:$0xff]  ;;  %v4193_v1 = vld [vmem:[#allocation29_spill] sm:$0xff] }
 0x27c   :  { %v1708_v52 = vadd.f32 %v3771_v41, %v3736_v20  ;;  %v1859_v31 = vrot.slane %v1702_v60, %v3666_v48  ;;  %v1863_v13 = vrot.slane %v1703_v39, %v3666_v48  ;;  %v1867_v5 = vrot.slane %v1704_v33, %v3666_v48 }
 0x27d   :  { %2195 = vxpose.xlu1.b32.start [1/4] (short) (narrow) %v2191_v0, 8  ;;  %v1709_v12 = vadd.f32 %v3771_v41, %v4191_v55  ;;  %v1769_v27 = vadd.f32 %v4192_v16, %v3771_v41  ;;  %v1770_v46 = vadd.f32 %v3730_v54, %v3771_v41  ;;  %v1771_v56 = vadd.f32 %v4193_v1, %v3771_v41 }
 0x27e   :  { %v1871_v20 = vrot.slane %v1705_v32, %v3666_v48  ;;  %v1966_v28 = vsel %vm1952_vm1, %v1863_v13, %v1859_v31  ;;  %v2062_v37 = vrot.slane %v1766_v24, %v3666_v48  ;;  %v2066_v4 = vrot.slane %v1767_v38, %v3666_v48  ;;  %v1646_v38 = vld [vmem:[%s4117_s3 + $0x8] sm:$0xff] }
 0x27f   :  { %v1772_v40 = vadd.f32 %v3733_v51, %v3771_v41  ;;  %v1875_v43 = vrot.slane %v1706_v23, %v3666_v48  ;;  %v1967_v44 = vsel %vm1954_vm2, %v1867_v5, %v1966_v28  ;;  %v2070_v54 = vrot.slane %v1768_v30, %v3666_v48  ;;  %v1650_v13 = vld [vmem:[%s4118_s4 + $0x8] sm:$0xff] }
 0x280   :  { %v1773_v8 = vadd.f32 %v4194_v7, %v3771_v41  ;;  %v1879_v59 = vrot.slane %v1707_v47, %v3666_v48  ;;  %v1883_v2 = vrot.slane %v1708_v52, %v3666_v48  ;;  %v1968_v62 = vsel %vm1956_vm3, %v1871_v20, %v1967_v44 }
 0x281   :  { %v1969_v60 = vsel %vm1958_vm4, %v1875_v43, %v1968_v62  ;;  %v2074_v39 = vrot.slane %v1769_v27, %v3666_v48  ;;  %v2162_v51 = vsel %vm1952_vm1, %v2066_v4, %v2062_v37  ;;  %v1757_v33 = vadd.f32 %v1644_v15, %v4187_v61 }
 0x282   :  { %v1887_v22 = vrot.slane %v1709_v12, %v3666_v48  ;;  %v1970_v58 = vsel %vm1960_vm5, %v1879_v59, %v1969_v60  ;;  %v2078_v32 = vrot.slane %v1770_v46, %v3666_v48  ;;  %v2163_v24 = vsel %vm1954_vm2, %v2070_v54, %v2162_v51 }
 0x283   :  { %v1971_v0 = vsel %vm1962_vm6, %v1883_v2, %v1970_v58  ;;  %v2082_v23 = vrot.slane %v1771_v56, %v3666_v48  ;;  %v2086_v57 = vrot.slane %v1772_v40, %v3666_v48  ;;  %v2164_v61 = vsel %vm1956_vm3, %v2074_v39, %v2163_v24  ;;  %v1647_v58 = vld [vmem:[%s4117_s3 + $0x10] sm:$0xff] }
 0x284   :  { %v1972_v47 = vsel %vm1964_vm7, %v1887_v22, %v1971_v0  ;;  %v2090_v30 = vrot.slane %v1773_v8, %v3666_v48  ;;  %v2165_v52 = vsel %vm1958_vm4, %v2078_v32, %v2164_v61  ;;  %v4004_v31 = vadd.f32 %v1757_v33, %v3771_v41 }
 0x285   :  { %v2166_v5 = vsel %vm1960_vm5, %v2082_v23, %v2165_v52  ;;  %v1710_v55 = vadd.f32 %v3771_v41, %v3742_v36  ;;  %v1711_v12 = vadd.f32 %v3771_v41, %v3739_v25  ;;  %v1712_v16 = vadd.f32 %v3771_v41, %v3760_v10 }
 0x286   :  { %v2150_v27 = vrot.slane %v3944_v45, %v3666_v48  ;;  %v1992_v46 = vmul.f32 %v1972_v47, %v1646_v38  ;;  %v2167_v1 = vsel %vm1962_vm6, %v2086_v57, %v2166_v5  ;;  %v1713_v56 = vadd.f32 %v3771_v41, %v3754_v3 }
 0x287   :  { %v2168_v20 = vsel %vm1964_vm7, %v2090_v30, %v2167_v1  ;;  %v1714_v36 = vadd.f32 %v3771_v41, %v3791_v26  ;;  %v1774_v25 = vadd.f32 %v3748_v18, %v3771_v41  ;;  %v1775_v10 = vadd.f32 %v3745_v63, %v3771_v41  ;;  %v1652_v30 = vld [vmem:[%s4118_s4 + $0x18] sm:$0xff] }
 0x288   :  { %v2188_v28 = vmul.f32 %v2168_v20, %v1650_v13  ;;  %v2154_v45 = vrot.slane %v4004_v31, %v3666_v48  ;;  %v1715_v37 = vadd.f32 %v3771_v41, %v3766_v53  ;;  %v1776_v3 = vadd.f32 %v3757_v35, %v3771_v41 }
 0x289   :  { %v1716_v4 = vadd.f32 %v3771_v41, %v3808_v49  ;;  %v1891_v26 = vrot.slane %v1710_v55, %v3666_v48  ;;  %v1895_v18 = vrot.slane %v1711_v12, %v3666_v48  ;;  %v1899_v15 = vrot.slane %v1712_v16, %v3666_v48 }
 0x28a   :  { %v2192_v63 = vsub.f32 %v1992_v46, %v2188_v28  ;;  %v1717_v40 = vadd.f32 %v3771_v41, %v3823_v42  ;;  %v1777_v43 = vadd.f32 %v3751_v50, %v3771_v41  ;;  %v1778_v53 = vadd.f32 %v3804_v29, %v3771_v41 }
 0x28b   :  { %v1903_v35 = vrot.slane %v1713_v56, %v3666_v48  ;;  %v1973_v49 = vsel %vm1952_vm1, %v1895_v18, %v1891_v26  ;;  %v2094_v44 = vrot.slane %v1774_v25, %v3666_v48  ;;  %v2098_v54 = vrot.slane %v1775_v10, %v3666_v48 }
 0x28c   :  { %2196 = vxpose.xlu1.b32.cont [2/4] (short) (narrow) %v2192_v63, 8  ;;  %v1779_v7 = vadd.f32 %v3775_v11, %v3771_v41  ;;  %v1907_v42 = vrot.slane %v1714_v36, %v3666_v48  ;;  %v1974_v8 = vsel %vm1954_vm2, %v1899_v15, %v1973_v49  ;;  %v2102_v50 = vrot.slane %v1776_v3, %v3666_v48 }
 0x28d   :  { %v1780_v29 = vadd.f32 %v3812_v9, %v3771_v41  ;;  %v1781_v59 = vadd.f32 %v3827_v21, %v3771_v41  ;;  %v1911_v2 = vrot.slane %v1715_v37, %v3666_v48  ;;  %v1975_v62 = vsel %vm1956_vm3, %v1903_v35, %v1974_v8 }
 0x28e   :  { %v1915_v60 = vrot.slane %v1716_v4, %v3666_v48  ;;  %v1976_v11 = vsel %vm1958_vm4, %v1907_v42, %v1975_v62  ;;  %v2106_v39 = vrot.slane %v1777_v43, %v3666_v48  ;;  %v2169_v51 = vsel %vm1952_vm1, %v2098_v54, %v2094_v44 }
 0x28f   :  { %v1919_v33 = vrot.slane %v1717_v40, %v3666_v48  ;;  %v1977_v22 = vsel %vm1960_vm5, %v1911_v2, %v1976_v11  ;;  %v2110_v9 = vrot.slane %v1778_v53, %v3666_v48  ;;  %v2170_v41 = vsel %vm1954_vm2, %v2102_v50, %v2169_v51 }
 0x290   :  { %v2180_v21 = vsel %vm1960_vm5, %v2146_v6, %v3924_v17  ;;  %v1978_v32 = vsel %vm1962_vm6, %v1915_v60, %v1977_v22  ;;  %v2114_v24 = vrot.slane %v1779_v7, %v3666_v48  ;;  %v2171_v38 = vsel %vm1956_vm3, %v2106_v39, %v2170_v41  ;;  %v1651_v6 = vld [vmem:[%s4118_s4 + $0x10] sm:$0xff] }
 0x291   :  { %v2181_v0 = vsel %vm1962_vm6, %v2150_v27, %v2180_v21  ;;  %v1979_v23 = vsel %vm1964_vm7, %v1919_v33, %v1978_v32  ;;  %v2118_v57 = vrot.slane %v1780_v29, %v3666_v48  ;;  %v2172_v19 = vsel %vm1958_vm4, %v2110_v9, %v2171_v38 }
 0x292   :  { %v1951_v17 = vrot.slane %v3936_v14, %v3666_v48  ;;  %v2122_v61 = vrot.slane %v1781_v59, %v3666_v48  ;;  %v2173_v47 = vsel %vm1960_vm5, %v2114_v24, %v2172_v19  ;;  %v2182_v52 = vsel %vm1964_vm7, %v2154_v45, %v2181_v0  ;;  %v1648_v14 = vld [vmem:[%s4117_s3 + $0x18] sm:$0xff]  ;;  %s2777_s3 = smov [#allocation9]  }
 0x293   :  { %v1993_v31 = vmul.f32 %v1979_v23, %v1647_v58  ;;  %v2174_v13 = vsel %vm1962_vm6, %v2118_v57, %v2173_v47  ;;  %v2190_v12 = vmul.f32 %v2182_v52, %v1652_v30  ;;  %s2249_s4 = sshll.u32 %s2777_s3, 4  ;;  %s2250_s4 = int_to_ptr.vmem [resolvable:$true] %s2249_s4 }
 0x294   :  { %v2175_v5 = vsel %vm1964_vm7, %v2122_v61, %v2174_v13  ;;  %v1986_v48 = vsel %vm1964_vm7, %v1951_v17, %v3939_v34  ;;  %s2743_s13 = scalar_lea.vmem %s2250_s4, 16  ;;  %s2747_s14 = scalar_lea.vmem %s2250_s4, 32 }
 0x295   :  { %v2189_v55 = vmul.f32 %v2175_v5, %v1651_v6  ;;  %v1994_v27 = vmul.f32 %v1986_v48, %v1648_v14  ;;  %p2744_p10 = scmp.ne.s32.totalorder %s2250_s4, %s2743_s13  ;;  %p2748_p11 = scmp.lt.s32.totalorder %s2250_s4, %s2250_s4 }
 0x296   :  { %p2749_p12 = scmp.lt.s32.totalorder %s2747_s14, %s2743_s13 }
 0x297   :  { %v2193_v16 = vsub.f32 %v1993_v31, %v2189_v55  ;;  %v2194_v46 = vsub.f32 %v1994_v27, %v2190_v12 }
 0x298   :  { %p2750_p13 = por %p2749_p12, %p2748_p11 }
 0x299   :  { %2197 = vxpose.xlu1.b32.cont [3/4] (short) (narrow) %v2193_v16, 8 }
 0x29a   :  { %p2751_p0 = pnand %p2750_p13, %p2744_p10 }
 0x29d   :  { %2198 = vxpose.xlu1.b32.end [4/4] (short) (narrow) %v2194_v46, 8 }
 0x311   :  { %v2211_v1 = vpop.trf.xlu1 }
 0x312   :  { %v2227_v56 = vsel %vm125_vm0, %v2211_v1, 0.0 }
 0x313   :  { %v2228_v20 = vrot.slane %v2227_v56, 4 }
 0x315   :  { %v2229_v36 = vadd.f32 %v2228_v20, %v2227_v56 }
 0x317   :  { %v2230_v25 = vrot.slane %v2229_v36, 2 }
 0x319   :  { %v2231_v10 = vadd.f32 %v2230_v25, %v2229_v36 }
 0x31b   :  { %v2232_v28 = vrot.slane %v2231_v10, 1 }
 0x31d   :  { %v2233_v45 = vadd.f32 %v2232_v28, %v2231_v10 }
 0x31f   :  { %v2359_v37 = vmul.f32 -2.0, %v2233_v45 }
 0x321   :  { %v2236_v3 = vmul.f32 1.442695, %v2359_v37 }
 0x323   :  { %2673 = vpow2.f32 %v2236_v3 }
 0x32d   :  { %v2674_v34 = vpop.eup %2673 }
 0x32e   :  { %v2238_v4 = vadd.f32 1.0, %v2674_v34 }
 0x330   :  { %2675 = vrcp.f32 %v2238_v4 }
 0x33a   :  { %v2676_v26 = vpop.eup %2675 }
 0x33b   :  { %2242 = vst.msk [vmem:[#allocation9] sm:$0x1] %vm2241_vm8, %v2676_v26 }
 0x33c   :  { %2754 = shalt.err (!%p2751_p0)
}
 0x33d   :  { %s2755_s19 = scalar_lea.hbm %s4124_s10, 16 }
 0x33e   :  { %p2756_p1 = scmp.ne.s32.totalorder %s4124_s10, %s2755_s19  ;;  %p2759_p2 = scmp.lt.u32.totalorder %s2755_s19, %s4124_s10 }
 0x340   :  { %p2761_p3 = pnand %p2759_p2, %p2756_p1 }
 0x342   :  { %2764 = shalt.err (!%p2761_p3)
}
 0x343   :  { %2252 = dma.vmem_to_hbm [thread:$0]  %s2250_s4, 16, %s4124_s10, [#allocation5]  }
 0x344   :  { %2769 = dma.done.wait [#allocation5], 16  }
 0x345   :  { %2770 = vsyncadd [#allocation5], 4294967280 }
 0x346   :  { %2256 = vsyncpa [#allocation4], 1 }
 0x347   :  { %2257 = vsyncpa [#allocation7], 1 }
 0x348   :  { %2258 = vsyncpa [#allocation5], 1 }

</bundles_post_ra>
